<compile_context>
chip_gen: v5e
topology: v5e:2x2
jax: 0.10.0
libtpu: 0.0.40
codegen_flags: <defaults>
</compile_context>

<pallas_src>
import jax
import jax.numpy as jnp
from jax.experimental import pallas as pl
from jax.experimental.pallas import tpu as pltpu

N_ITER = 3  # matches forward(x, n_iter=3)

# Memory-space enum (recent jax: pltpu.MemorySpace; older: pltpu.TPUMemorySpace)
_MEMSPACE = getattr(pltpu, "MemorySpace", None) or getattr(pltpu, "TPUMemorySpace")


# ----------------------------- Pallas kernel --------------------------------
def _smpl_mlp_kernel(xf_ref, w1f_ref, w1s_ref, b1_ref, w2_ref, b2_ref,
                     wdec_ref, bdec_ref, init_ref, out_ref):
    TB = xf_ref.shape[0]
    SW = init_ref.shape[1]

    # xf's fc1 contribution (+ fc1 bias) is loop-invariant -> hoist it.
    # x is already bf16 (cast in the wrapper); accumulate in f32 on the MXU.
    xf_proj = jnp.dot(xf_ref[...], w1f_ref[...],
                      preferred_element_type=jnp.float32) + b1_ref[...]

    # (1, .) biases broadcast inside the adds (no TBxH / TBxSW materialization).
    b2 = b2_ref[...]
    bdec = bdec_ref[...]

    # Running state [pose|betas|cam|pad] (f32, residual recurrence).
    state = jnp.broadcast_to(init_ref[...], (TB, SW))

    for it in range(N_ITER):
        h = xf_proj + jnp.dot(state.astype(jnp.bfloat16), w1s_ref[...],
                              preferred_element_type=jnp.float32)
        h = jnp.maximum(h, 0.0)
        # TODO(synk): nn.Dropout treated as identity (inference/eval mode).
        h = jnp.dot(h.astype(jnp.bfloat16), w2_ref[...],
                    preferred_element_type=jnp.float32) + b2
        h = jnp.maximum(h, 0.0)
        # Combined decpose/decshape/deccam residual update (lane-dense SW).
        state = state + jnp.dot(h.astype(jnp.bfloat16), wdec_ref[...],
                                preferred_element_type=jnp.float32) + bdec
        out_ref[it] = state


# ------------------------------ JAX glue -------------------------------------
def rot6d_to_rotmat(x):
    """(N, 6) -> (N, 3, 3). Matches the torch reference (columns b1, b2, b3)."""
    x = x.reshape(-1, 6)
    a1 = x[:, 0:3]
    a2 = x[:, 3:6]

    def _normalize(v):
        n = jnp.sqrt(jnp.sum(v * v, axis=-1, keepdims=True))
        return v / jnp.maximum(n, 1e-12)

    b1 = _normalize(a1)
    dot = jnp.sum(b1 * a2, axis=-1, keepdims=True)
    b2 = _normalize(a2 - dot * b1)
    b3 = jnp.cross(b1, b2)
    return jnp.stack([b1, b2, b3], axis=-1)


def _pick_batch_tile(B):
    """bf16 x -> keep the batch (sublane) tile a multiple of 16.  Prefer the
    largest tile that still yields >= 2 grid steps (feeds both v7x TCs) while
    keeping tiles big (fewer grid steps) on v5e/v6e."""
    if B < 32 or B % 16 != 0:
        return B  # tiny / odd batch: one full-batch tile (full-dim block legal)
    for tb in (512, 256, 128, 64, 32, 16):
        if tb <= B // 2 and B % tb == 0:
            return tb
    return B


def pack_params(params, hidden, npose):
    """Pack f32 reference params into the bf16/f32 lane-dense layout the kernel
    consumes (combined [pose|betas|cam|pad] state of width SW)."""
    SW = ((npose + 13 + 127) // 128) * 128  # 256 for SMPL (144 + 13 -> 256)
    pad = SW - (npose + 13)
    f32, bf16 = jnp.float32, jnp.bfloat16

    w1_state = jnp.concatenate(
        [params["w1_pose"], params["w1_betas"], params["w1_cam"],
         jnp.zeros((pad, hidden), f32)], axis=0)
    wdec = jnp.concatenate(
        [params["wp"], params["ws"], params["wc"],
         jnp.zeros((hidden, pad), f32)], axis=1)
    bdec = jnp.concatenate(
        [params["bp"], params["bs"], params["bc"], jnp.zeros((1, pad), f32)],
        axis=1)
    init_state = jnp.concatenate(
        [params["init_body_pose"], params["init_betas"], params["init_cam"],
         jnp.zeros((1, pad), f32)], axis=1)

    packed = {
        "w1f": params["w1_feat"].astype(bf16),
        "w1s": w1_state.astype(bf16),
        "b1": params["b1"].astype(f32),
        "w2": params["w2"].astype(bf16),
        "b2": params["b2"].astype(f32),
        "wdec": wdec.astype(bf16),
        "bdec": bdec.astype(f32),
        "init_state": init_state.astype(f32),
    }
    return packed, SW


def _vmem_limit_bytes(TB, input_dim, hidden, SW, weight_bytes):
    # weights single-buffered + double-buffered x/out tiles + intermediates,
    # with 1.5x headroom for compiler scratch.  Capped at 48 MiB so the request
    # is safe on v7x (64 MiB physical VMEM); v5e/v6e have 128 MiB.
    streamed = 2 * (TB * input_dim * 2) + 2 * (N_ITER * TB * SW * 4)
    interm = (2 * TB * hidden + 2 * TB * SW) * 4
    need = weight_bytes + streamed + interm
    return int(max(8 * 1024 * 1024, min(1.5 * need, 48 * 1024 * 1024)))


def _run_kernel(x, params):
    """Runs the Pallas kernel; returns (pose_all, betas_all, cam_all) with
    shapes (N_ITER, B, npose) / (N_ITER, B, 10) / (N_ITER, B, 3) in f32."""
    B, input_dim = x.shape
    npose = params["init_body_pose"].shape[1]
    hidden = params["b1"].shape[1]

    packed, SW = pack_params(params, hidden, npose)
    TB = _pick_batch_tile(B)
    grid = (B // TB,)

    # x is the only streamed operand -> stream it in bf16.
    x_bf16 = x.astype(jnp.bfloat16)

    # Loop-invariant weights/biases: whole-array VMEM operands (single copy).
    wspec = pl.BlockSpec(memory_space=_MEMSPACE.VMEM)

    weight_bytes = int(
        (packed["w1f"].size + packed["w1s"].size + packed["w2"].size +
         packed["wdec"].size) * 2 +
        (packed["b1"].size + packed["b2"].size + packed["bdec"].size +
         packed["init_state"].size) * 4)
    flops = int(2 * B * input_dim * hidden +
                N_ITER * 2 * B * (SW * hidden + hidden * hidden + hidden * SW))
    bytes_accessed = int(B * input_dim * 2 + weight_bytes + N_ITER * B * SW * 4)

    out_all = pl.pallas_call(
        _smpl_mlp_kernel,
        out_shape=jax.ShapeDtypeStruct((N_ITER, B, SW), jnp.float32),
        grid=grid,
        in_specs=[
            pl.BlockSpec((TB, input_dim), lambda i: (i, 0)),   # x (batch-tiled)
            wspec,   # w1f   (bf16)
            wspec,   # w1s   (bf16)
            wspec,   # b1    (f32)
            wspec,   # w2    (bf16)
            wspec,   # b2    (f32)
            wspec,   # wdec  (bf16)
            wspec,   # bdec  (f32)
            wspec,   # init_state (f32)
        ],
        out_specs=pl.BlockSpec((N_ITER, TB, SW), lambda i: (0, i, 0)),
        compiler_params=pltpu.CompilerParams(
            dimension_semantics=("parallel",),
            vmem_limit_bytes=_vmem_limit_bytes(TB, input_dim, hidden, SW,
                                               weight_bytes)),
        cost_estimate=pl.CostEstimate(flops=flops, transcendentals=0,
                                      bytes_accessed=bytes_accessed),
    )(x_bf16, packed["w1f"], packed["w1s"], packed["b1"], packed["w2"],
      packed["b2"], packed["wdec"], packed["bdec"], packed["init_state"])

    # Slice the lane-padded slab back into pose/betas/cam (wrapper-side, cheap).
    pose_all = out_all[:, :, :npose]
    betas_all = out_all[:, :, npose:npose + 10]
    cam_all = out_all[:, :, npose + 10:npose + 13]
    return pose_all, betas_all, cam_all


def smpl_head_forward(x, params, n_iter=N_ITER):
    assert n_iter == N_ITER
    B = x.shape[0]
    npose = params["init_body_pose"].shape[1]
    num_joints = npose // 6  # NUM_BODY_JOINTS + 1

    pose_all, betas_all, cam_all = _run_kernel(x, params)

    pred_body_pose = pose_all[-1]
    pred_betas = betas_all[-1]
    pred_cam = cam_all[-1]

    # torch.cat(list_of_iters, dim=0) == reshape(N_ITER * B, ...)
    all_rotmats = rot6d_to_rotmat(
        pose_all.reshape(N_ITER * B, npose)).reshape(N_ITER * B, num_joints, 3, 3)
    pred_smpl_params_list = {
        "body_pose": all_rotmats[:, 1:, :, :],
        "betas": betas_all.reshape(N_ITER * B, 10),
        "cam": cam_all.reshape(N_ITER * B, 3),
    }

    rotmats = rot6d_to_rotmat(pred_body_pose).reshape(B, num_joints, 3, 3)
    pred_smpl_params = {
        "global_orient": rotmats[:, 0:1],
        "body_pose": rotmats[:, 1:],
        "betas": pred_betas,
    }
    return pred_smpl_params, pred_cam, pred_smpl_params_list


# ---------------------- pure-JAX f32 reference (for checking) ---------------
def _reference_states(x, params, n_iter=N_ITER):
    B = x.shape[0]
    npose = params["init_body_pose"].shape[1]
    pose = jnp.broadcast_to(params["init_body_pose"], (B, npose))
    betas = jnp.broadcast_to(params["init_betas"], (B, 10))
    cam = jnp.broadcast_to(params["init_cam"], (B, 3))
    w1 = jnp.concatenate([params["w1_feat"], params["w1_pose"],
                          params["w1_betas"], params["w1_cam"]], axis=0)
    poses, betass, cams = [], [], []
    for _ in range(n_iter):
        xc = jnp.concatenate([x, pose, betas, cam], axis=1)
        h = jax.nn.relu(xc @ w1 + params["b1"])
        h = jax.nn.relu(h @ params["w2"] + params["b2"])
        pose = pose + h @ params["wp"] + params["bp"]
        betas = betas + h @ params["ws"] + params["bs"]
        cam = cam + h @ params["wc"] + params["bc"]
        poses.append(pose)
        betass.append(betas)
        cams.append(cam)
    return jnp.stack(poses), jnp.stack(betass), jnp.stack(cams)


# --------------------------- deterministic params ----------------------------
def init_params(key, input_dim, hidden, npose):
    keys = jax.random.split(key, 12)

    def xavier(k, shape, gain=1.0):
        fan_in, fan_out = shape
        bound = gain * jnp.sqrt(6.0 / (fan_in + fan_out))
        return jax.random.uniform(k, shape, jnp.float32, -bound, bound)

    in_dim = input_dim + npose + 13
    w1 = xavier(keys[0], (in_dim, hidden))               # fc1 weight^T
    w2 = xavier(keys[1], (hidden, hidden))               # fc2 weight^T
    wp = xavier(keys[2], (hidden, npose), gain=0.01)     # decpose weight^T
    ws = xavier(keys[3], (hidden, 10), gain=0.01)        # decshape weight^T
    wc = xavier(keys[4], (hidden, 3), gain=0.01)         # deccam weight^T

    return {
        # fc1 weight split along the concatenated input dimension
        "w1_feat": w1[:input_dim],
        "w1_pose": w1[input_dim:input_dim + npose],
        "w1_betas": w1[input_dim + npose:input_dim + npose + 10],
        "w1_cam": w1[input_dim + npose + 10:],
        "b1": 0.01 * jax.random.normal(keys[5], (1, hidden), jnp.float32),
        "w2": w2,
        "b2": 0.01 * jax.random.normal(keys[6], (1, hidden), jnp.float32),
        "wp": wp,
        "bp": 0.01 * jax.random.normal(keys[7], (1, npose), jnp.float32),
        "ws": ws,
        "bs": 0.01 * jax.random.normal(keys[8], (1, 10), jnp.float32),
        "wc": wc,
        "bc": 0.01 * jax.random.normal(keys[9], (1, 3), jnp.float32),
        # synthetic "mean params" buffers (deterministic, not loaded from file)
        "init_body_pose": 0.1 * jax.random.normal(keys[10], (1, npose), jnp.float32),
        "init_betas": 0.1 * jax.random.normal(keys[11], (1, 10), jnp.float32),
        "init_cam": jnp.array([[0.9, 0.0, 0.0]], jnp.float32),
    }


if __name__ == "__main__":
    key = jax.random.PRNGKey(0)
    B = 2
    INPUT_DIM = 256       # small stand-in for the ResNet50 2048-d feature
    HIDDEN = 256          # small stand-in for the 1024-d hidden layers
    NUM_BODY_JOINTS = 23  # SMPL: npose = 6 * (23 + 1) = 144
    npose = 6 * (NUM_BODY_JOINTS + 1)

    kx, kp = jax.random.split(key)
    x = jax.random.normal(kx, (B, INPUT_DIM), jnp.float32)
    params = init_params(kp, INPUT_DIM, HIDDEN, npose)

    # Numerical check of the Pallas kernel against the pure-JAX f32 reference
    # (bf16 operands / f32 accumulation -> small rounding, generous tolerance).
    pose_k, betas_k, cam_k = _run_kernel(x, params)
    jax.block_until_ready((pose_k, betas_k, cam_k))
    pose_r, betas_r, cam_r = _reference_states(x, params)
    err = max(float(jnp.max(jnp.abs(pose_k - pose_r))),
              float(jnp.max(jnp.abs(betas_k - betas_r))),
              float(jnp.max(jnp.abs(cam_k - cam_r))))
    assert err < 5e-2, f"kernel vs reference max-abs error too large: {err}"

    out = smpl_head_forward(x, params)
    jax.block_until_ready(out)

    pred_smpl_params, pred_cam, pred_list = out
    assert pred_smpl_params["global_orient"].shape == (B, 1, 3, 3)
    assert pred_smpl_params["body_pose"].shape == (B, NUM_BODY_JOINTS, 3, 3)
    assert pred_smpl_params["betas"].shape == (B, 10)
    assert pred_cam.shape == (B, 3)
    assert pred_list["body_pose"].shape == (N_ITER * B, NUM_BODY_JOINTS, 3, 3)
    assert pred_list["betas"].shape == (N_ITER * B, 10)
    assert pred_list["cam"].shape == (N_ITER * B, 3)
    print("KERNEL_OK")
</pallas_src>

<mosaic_0001>
module attributes {stable_mosaic.version = 11 : i64} {
  func.func @_smpl_mlp_kernel(%arg0: i32, %arg1: memref<2x256xbf16, #tpu.memory_space<vmem>>, %arg2: memref<256x256xbf16, #tpu.memory_space<vmem>>, %arg3: memref<256x256xbf16, #tpu.memory_space<vmem>>, %arg4: memref<1x256xf32, #tpu.memory_space<vmem>>, %arg5: memref<256x256xbf16, #tpu.memory_space<vmem>>, %arg6: memref<1x256xf32, #tpu.memory_space<vmem>>, %arg7: memref<256x256xbf16, #tpu.memory_space<vmem>>, %arg8: memref<1x256xf32, #tpu.memory_space<vmem>>, %arg9: memref<1x256xf32, #tpu.memory_space<vmem>>, %arg10: memref<3x2x256xf32, #tpu.memory_space<vmem>>) attributes {dimension_semantics = [#tpu.dimension_semantics<parallel>], iteration_bounds = array<i64: 1>, scalar_prefetch = 0 : i64, scratch_operands = 0 : i64, tpu.core_type = #tpu.core_type<tc>, window_params = [{transform_indices = @transform_0, window_bounds = array<i64: 2, 256>}, {pipeline_mode = #tpu.pipeline_mode<synchronous>, transform_indices = @transform_1, window_bounds = array<i64: 256, 256>}, {pipeline_mode = #tpu.pipeline_mode<synchronous>, transform_indices = @transform_2, window_bounds = array<i64: 256, 256>}, {pipeline_mode = #tpu.pipeline_mode<synchronous>, transform_indices = @transform_3, window_bounds = array<i64: 1, 256>}, {pipeline_mode = #tpu.pipeline_mode<synchronous>, transform_indices = @transform_4, window_bounds = array<i64: 256, 256>}, {pipeline_mode = #tpu.pipeline_mode<synchronous>, transform_indices = @transform_5, window_bounds = array<i64: 1, 256>}, {pipeline_mode = #tpu.pipeline_mode<synchronous>, transform_indices = @transform_6, window_bounds = array<i64: 256, 256>}, {pipeline_mode = #tpu.pipeline_mode<synchronous>, transform_indices = @transform_7, window_bounds = array<i64: 1, 256>}, {pipeline_mode = #tpu.pipeline_mode<synchronous>, transform_indices = @transform_8, window_bounds = array<i64: 1, 256>}, {transform_indices = @transform_9, window_bounds = array<i64: 3, 2, 256>}]} {
    %c0 = arith.constant 0 : index
    %c0_0 = arith.constant 0 : index
    %0 = vector.load %arg1[%c0, %c0_0] : memref<2x256xbf16, #tpu.memory_space<vmem>>, vector<2x256xbf16>
    %c0_1 = arith.constant 0 : index
    %c0_2 = arith.constant 0 : index
    %1 = vector.load %arg2[%c0_1, %c0_2] : memref<256x256xbf16, #tpu.memory_space<vmem>>, vector<256x256xbf16>
    %cst = arith.constant dense<0.000000e+00> : vector<2x256xf32>
    %2 = tpu.matmul %0, %1, %cst {dimension_numbers = #tpu.dot_dimension_numbers<[1], [0], [0], [1], [0, 0, 1, 1], [], []>} : vector<2x256xbf16>, vector<256x256xbf16>, vector<2x256xf32> -> vector<2x256xf32>
    %c0_3 = arith.constant 0 : index
    %c0_4 = arith.constant 0 : index
    %3 = vector.load %arg4[%c0_3, %c0_4] : memref<1x256xf32, #tpu.memory_space<vmem>>, vector<1x256xf32>
    %4 = vector.broadcast %3 : vector<1x256xf32> to vector<2x256xf32>
    %5 = arith.addf %2, %4 : vector<2x256xf32>
    %c0_5 = arith.constant 0 : index
    %c0_6 = arith.constant 0 : index
    %6 = vector.load %arg6[%c0_5, %c0_6] : memref<1x256xf32, #tpu.memory_space<vmem>>, vector<1x256xf32>
    %c0_7 = arith.constant 0 : index
    %c0_8 = arith.constant 0 : index
    %7 = vector.load %arg8[%c0_7, %c0_8] : memref<1x256xf32, #tpu.memory_space<vmem>>, vector<1x256xf32>
    %c0_9 = arith.constant 0 : index
    %c0_10 = arith.constant 0 : index
    %8 = vector.load %arg9[%c0_9, %c0_10] : memref<1x256xf32, #tpu.memory_space<vmem>>, vector<1x256xf32>
    %9 = vector.shape_cast %8 : vector<1x256xf32> to vector<1x256xf32>
    %10 = vector.broadcast %9 : vector<1x256xf32> to vector<2x256xf32>
    %11 = arith.truncf %10 : vector<2x256xf32> to vector<2x256xbf16>
    %c0_11 = arith.constant 0 : index
    %c0_12 = arith.constant 0 : index
    %12 = vector.load %arg3[%c0_11, %c0_12] : memref<256x256xbf16, #tpu.memory_space<vmem>>, vector<256x256xbf16>
    %cst_13 = arith.constant dense<0.000000e+00> : vector<2x256xf32>
    %13 = tpu.matmul %11, %12, %cst_13 {dimension_numbers = #tpu.dot_dimension_numbers<[1], [0], [0], [1], [0, 0, 1, 1], [], []>} : vector<2x256xbf16>, vector<256x256xbf16>, vector<2x256xf32> -> vector<2x256xf32>
    %14 = arith.addf %5, %13 : vector<2x256xf32>
    %cst_14 = arith.constant 0.000000e+00 : f32
    %15 = vector.broadcast %cst_14 : f32 to vector<2x256xf32>
    %16 = arith.maximumf %14, %15 : vector<2x256xf32>
    %17 = arith.truncf %16 : vector<2x256xf32> to vector<2x256xbf16>
    %c0_15 = arith.constant 0 : index
    %c0_16 = arith.constant 0 : index
    %18 = vector.load %arg5[%c0_15, %c0_16] : memref<256x256xbf16, #tpu.memory_space<vmem>>, vector<256x256xbf16>
    %cst_17 = arith.constant dense<0.000000e+00> : vector<2x256xf32>
    %19 = tpu.matmul %17, %18, %cst_17 {dimension_numbers = #tpu.dot_dimension_numbers<[1], [0], [0], [1], [0, 0, 1, 1], [], []>} : vector<2x256xbf16>, vector<256x256xbf16>, vector<2x256xf32> -> vector<2x256xf32>
    %20 = vector.broadcast %6 : vector<1x256xf32> to vector<2x256xf32>
    %21 = arith.addf %19, %20 : vector<2x256xf32>
    %cst_18 = arith.constant 0.000000e+00 : f32
    %22 = vector.broadcast %cst_18 : f32 to vector<2x256xf32>
    %23 = arith.maximumf %21, %22 : vector<2x256xf32>
    %24 = arith.truncf %23 : vector<2x256xf32> to vector<2x256xbf16>
    %c0_19 = arith.constant 0 : index
    %c0_20 = arith.constant 0 : index
    %25 = vector.load %arg7[%c0_19, %c0_20] : memref<256x256xbf16, #tpu.memory_space<vmem>>, vector<256x256xbf16>
    %cst_21 = arith.constant dense<0.000000e+00> : vector<2x256xf32>
    %26 = tpu.matmul %24, %25, %cst_21 {dimension_numbers = #tpu.dot_dimension_numbers<[1], [0], [0], [1], [0, 0, 1, 1], [], []>} : vector<2x256xbf16>, vector<256x256xbf16>, vector<2x256xf32> -> vector<2x256xf32>
    %27 = arith.addf %10, %26 : vector<2x256xf32>
    %28 = vector.broadcast %7 : vector<1x256xf32> to vector<2x256xf32>
    %29 = arith.addf %27, %28 : vector<2x256xf32>
    %c0_22 = arith.constant 0 : index
    %c0_23 = arith.constant 0 : index
    %c0_24 = arith.constant 0 : index
    %30 = vector.load %arg10[%c0_22, %c0_23, %c0_24] : memref<3x2x256xf32, #tpu.memory_space<vmem>>, vector<1x2x256xf32>
    %31 = vector.shape_cast %30 : vector<1x2x256xf32> to vector<2x256xf32>
    %32 = vector.shape_cast %29 : vector<2x256xf32> to vector<1x2x256xf32>
    tpu.vector_store %arg10[%c0_22, %c0_23, %c0_24], %32 {strides = array<i32>} : memref<3x2x256xf32, #tpu.memory_space<vmem>>, vector<1x2x256xf32>,
    %33 = arith.truncf %29 : vector<2x256xf32> to vector<2x256xbf16>
    %c0_25 = arith.constant 0 : index
    %c0_26 = arith.constant 0 : index
    %34 = vector.load %arg3[%c0_25, %c0_26] : memref<256x256xbf16, #tpu.memory_space<vmem>>, vector<256x256xbf16>
    %cst_27 = arith.constant dense<0.000000e+00> : vector<2x256xf32>
    %35 = tpu.matmul %33, %34, %cst_27 {dimension_numbers = #tpu.dot_dimension_numbers<[1], [0], [0], [1], [0, 0, 1, 1], [], []>} : vector<2x256xbf16>, vector<256x256xbf16>, vector<2x256xf32> -> vector<2x256xf32>
    %36 = arith.addf %5, %35 : vector<2x256xf32>
    %cst_28 = arith.constant 0.000000e+00 : f32
    %37 = vector.broadcast %cst_28 : f32 to vector<2x256xf32>
    %38 = arith.maximumf %36, %37 : vector<2x256xf32>
    %39 = arith.truncf %38 : vector<2x256xf32> to vector<2x256xbf16>
    %c0_29 = arith.constant 0 : index
    %c0_30 = arith.constant 0 : index
    %40 = vector.load %arg5[%c0_29, %c0_30] : memref<256x256xbf16, #tpu.memory_space<vmem>>, vector<256x256xbf16>
    %cst_31 = arith.constant dense<0.000000e+00> : vector<2x256xf32>
    %41 = tpu.matmul %39, %40, %cst_31 {dimension_numbers = #tpu.dot_dimension_numbers<[1], [0], [0], [1], [0, 0, 1, 1], [], []>} : vector<2x256xbf16>, vector<256x256xbf16>, vector<2x256xf32> -> vector<2x256xf32>
    %42 = vector.broadcast %6 : vector<1x256xf32> to vector<2x256xf32>
    %43 = arith.addf %41, %42 : vector<2x256xf32>
    %cst_32 = arith.constant 0.000000e+00 : f32
    %44 = vector.broadcast %cst_32 : f32 to vector<2x256xf32>
    %45 = arith.maximumf %43, %44 : vector<2x256xf32>
    %46 = arith.truncf %45 : vector<2x256xf32> to vector<2x256xbf16>
    %c0_33 = arith.constant 0 : index
    %c0_34 = arith.constant 0 : index
    %47 = vector.load %arg7[%c0_33, %c0_34] : memref<256x256xbf16, #tpu.memory_space<vmem>>, vector<256x256xbf16>
    %cst_35 = arith.constant dense<0.000000e+00> : vector<2x256xf32>
    %48 = tpu.matmul %46, %47, %cst_35 {dimension_numbers = #tpu.dot_dimension_numbers<[1], [0], [0], [1], [0, 0, 1, 1], [], []>} : vector<2x256xbf16>, vector<256x256xbf16>, vector<2x256xf32> -> vector<2x256xf32>
    %49 = arith.addf %29, %48 : vector<2x256xf32>
    %50 = vector.broadcast %7 : vector<1x256xf32> to vector<2x256xf32>
    %51 = arith.addf %49, %50 : vector<2x256xf32>
    %c1 = arith.constant 1 : index
    %c0_36 = arith.constant 0 : index
    %c0_37 = arith.constant 0 : index
    %52 = vector.load %arg10[%c1, %c0_36, %c0_37] : memref<3x2x256xf32, #tpu.memory_space<vmem>>, vector<1x2x256xf32>
    %53 = vector.shape_cast %52 : vector<1x2x256xf32> to vector<2x256xf32>
    %54 = vector.shape_cast %51 : vector<2x256xf32> to vector<1x2x256xf32>
    tpu.vector_store %arg10[%c1, %c0_36, %c0_37], %54 {strides = array<i32>} : memref<3x2x256xf32, #tpu.memory_space<vmem>>, vector<1x2x256xf32>,
    %55 = arith.truncf %51 : vector<2x256xf32> to vector<2x256xbf16>
    %c0_38 = arith.constant 0 : index
    %c0_39 = arith.constant 0 : index
    %56 = vector.load %arg3[%c0_38, %c0_39] : memref<256x256xbf16, #tpu.memory_space<vmem>>, vector<256x256xbf16>
    %cst_40 = arith.constant dense<0.000000e+00> : vector<2x256xf32>
    %57 = tpu.matmul %55, %56, %cst_40 {dimension_numbers = #tpu.dot_dimension_numbers<[1], [0], [0], [1], [0, 0, 1, 1], [], []>} : vector<2x256xbf16>, vector<256x256xbf16>, vector<2x256xf32> -> vector<2x256xf32>
    %58 = arith.addf %5, %57 : vector<2x256xf32>
    %cst_41 = arith.constant 0.000000e+00 : f32
    %59 = vector.broadcast %cst_41 : f32 to vector<2x256xf32>
    %60 = arith.maximumf %58, %59 : vector<2x256xf32>
    %61 = arith.truncf %60 : vector<2x256xf32> to vector<2x256xbf16>
    %c0_42 = arith.constant 0 : index
    %c0_43 = arith.constant 0 : index
    %62 = vector.load %arg5[%c0_42, %c0_43] : memref<256x256xbf16, #tpu.memory_space<vmem>>, vector<256x256xbf16>
    %cst_44 = arith.constant dense<0.000000e+00> : vector<2x256xf32>
    %63 = tpu.matmul %61, %62, %cst_44 {dimension_numbers = #tpu.dot_dimension_numbers<[1], [0], [0], [1], [0, 0, 1, 1], [], []>} : vector<2x256xbf16>, vector<256x256xbf16>, vector<2x256xf32> -> vector<2x256xf32>
    %64 = vector.broadcast %6 : vector<1x256xf32> to vector<2x256xf32>
    %65 = arith.addf %63, %64 : vector<2x256xf32>
    %cst_45 = arith.constant 0.000000e+00 : f32
    %66 = vector.broadcast %cst_45 : f32 to vector<2x256xf32>
    %67 = arith.maximumf %65, %66 : vector<2x256xf32>
    %68 = arith.truncf %67 : vector<2x256xf32> to vector<2x256xbf16>
    %c0_46 = arith.constant 0 : index
    %c0_47 = arith.constant 0 : index
    %69 = vector.load %arg7[%c0_46, %c0_47] : memref<256x256xbf16, #tpu.memory_space<vmem>>, vector<256x256xbf16>
    %cst_48 = arith.constant dense<0.000000e+00> : vector<2x256xf32>
    %70 = tpu.matmul %68, %69, %cst_48 {dimension_numbers = #tpu.dot_dimension_numbers<[1], [0], [0], [1], [0, 0, 1, 1], [], []>} : vector<2x256xbf16>, vector<256x256xbf16>, vector<2x256xf32> -> vector<2x256xf32>
    %71 = arith.addf %51, %70 : vector<2x256xf32>
    %72 = vector.broadcast %7 : vector<1x256xf32> to vector<2x256xf32>
    %73 = arith.addf %71, %72 : vector<2x256xf32>
    %c2 = arith.constant 2 : index
    %c0_49 = arith.constant 0 : index
    %c0_50 = arith.constant 0 : index
    %74 = vector.load %arg10[%c2, %c0_49, %c0_50] : memref<3x2x256xf32, #tpu.memory_space<vmem>>, vector<1x2x256xf32>
    %75 = vector.shape_cast %74 : vector<1x2x256xf32> to vector<2x256xf32>
    %76 = vector.shape_cast %73 : vector<2x256xf32> to vector<1x2x256xf32>
    tpu.vector_store %arg10[%c2, %c0_49, %c0_50], %76 {strides = array<i32>} : memref<3x2x256xf32, #tpu.memory_space<vmem>>, vector<1x2x256xf32>,
    return
  }
  func.func @transform_0(%arg0: i32) -> (i32, i32) {
    %c0_i32 = arith.constant 0 : i32
    %c0_i32_0 = arith.constant 0 : i32
    return %arg0, %c0_i32 : i32, i32
  }
  func.func @transform_1(%arg0: i32) -> (i32, i32) {
    %c0_i32 = arith.constant 0 : i32
    %c0_i32_0 = arith.constant 0 : i32
    %c0_i32_1 = arith.constant 0 : i32
    return %c0_i32, %c0_i32_0 : i32, i32
  }
  func.func @transform_2(%arg0: i32) -> (i32, i32) {
    %c0_i32 = arith.constant 0 : i32
    %c0_i32_0 = arith.constant 0 : i32
    %c0_i32_1 = arith.constant 0 : i32
    return %c0_i32, %c0_i32_0 : i32, i32
  }
  func.func @transform_3(%arg0: i32) -> (i32, i32) {
    %c0_i32 = arith.constant 0 : i32
    %c0_i32_0 = arith.constant 0 : i32
    %c0_i32_1 = arith.constant 0 : i32
    return %c0_i32, %c0_i32_0 : i32, i32
  }
  func.func @transform_4(%arg0: i32) -> (i32, i32) {
    %c0_i32 = arith.constant 0 : i32
    %c0_i32_0 = arith.constant 0 : i32
    %c0_i32_1 = arith.constant 0 : i32
    return %c0_i32, %c0_i32_0 : i32, i32
  }
  func.func @transform_5(%arg0: i32) -> (i32, i32) {
    %c0_i32 = arith.constant 0 : i32
    %c0_i32_0 = arith.constant 0 : i32
    %c0_i32_1 = arith.constant 0 : i32
    return %c0_i32, %c0_i32_0 : i32, i32
  }
  func.func @transform_6(%arg0: i32) -> (i32, i32) {
    %c0_i32 = arith.constant 0 : i32
    %c0_i32_0 = arith.constant 0 : i32
    %c0_i32_1 = arith.constant 0 : i32
    return %c0_i32, %c0_i32_0 : i32, i32
  }
  func.func @transform_7(%arg0: i32) -> (i32, i32) {
    %c0_i32 = arith.constant 0 : i32
    %c0_i32_0 = arith.constant 0 : i32
    %c0_i32_1 = arith.constant 0 : i32
    return %c0_i32, %c0_i32_0 : i32, i32
  }
  func.func @transform_8(%arg0: i32) -> (i32, i32) {
    %c0_i32 = arith.constant 0 : i32
    %c0_i32_0 = arith.constant 0 : i32
    %c0_i32_1 = arith.constant 0 : i32
    return %c0_i32, %c0_i32_0 : i32, i32
  }
  func.func @transform_9(%arg0: i32) -> (i32, i32, i32) {
    %c0_i32 = arith.constant 0 : i32
    %c0_i32_0 = arith.constant 0 : i32
    %c0_i32_1 = arith.constant 0 : i32
    return %c0_i32, %arg0, %c0_i32_0 : i32, i32, i32
  }
}

</mosaic_0001>

<bundles_post_ra>
// kernel: tpu_custom_call.1
= control target key start
LH: loop header
LB: loop body
LE: loop exit
PB: predicated region body
PF: predicated region fallthrough
CT: control target
= control target key end

     0   :  { %14 = vsyncpa [#allocation3], 0  ;;  %s4660_s0 = inlined_call_operand.hbm [shape: bf16[2,256], index: 0, kind: input, shape index: {}]   ;;  %s4661_s1 = inlined_call_operand.hbm [shape: bf16[256,256], index: 1, kind: input, shape index: {}]   ;;  %s4662_s2 = inlined_call_operand.hbm [shape: bf16[256,256], index: 2, kind: input, shape index: {}]   ;;  %s4663_s3 = inlined_call_operand.vmem [shape: f32[1,256], index: 3, kind: input, shape index: {}]   ;;  %s4664_s4 = inlined_call_operand.hbm [shape: bf16[256,256], index: 4, kind: input, shape index: {}]   ;;  %s4665_s5 = inlined_call_operand.vmem [shape: f32[1,256], index: 5, kind: input, shape index: {}]   ;;  %s4666_s6 = inlined_call_operand.hbm [shape: bf16[256,256], index: 6, kind: input, shape index: {}]   ;;  %s4667_s7 = inlined_call_operand.vmem [shape: f32[1,256], index: 7, kind: input, shape index: {}]   ;;  %s4668_s8 = inlined_call_operand.hbm [shape: f32[1,256], index: 8, kind: input, shape index: {}]   ;;  %s4669_s9 = inlined_call_operand.hbm [shape: f32[3,2,256], index: 9, kind: output, shape index: {}]  }
   0x1   :  { %15 = vsyncpa [#allocation6], 0 }
   0x2   :  { %16 = vsyncpa [#allocation9], 0 }
   0x3   :  { %17 = vsyncpa [#allocation12], 0  ;;  %s34_s11 = sshll.u32 %s4661_s1, 4  ;;  %s35_s11 = int_to_ptr.hbm [resolvable:$true] %s34_s11 }
   0x4   :  { %18 = vsyncpa [#allocation4], 0  ;;  %s4474_s12 = smov [#allocation5]   ;;  %s62_s16 = sshll.u32 %s4664_s4, 4  ;;  %s63_s16 = int_to_ptr.hbm [resolvable:$true] %s62_s16 }
   0x5   :  { %s36_s13 = sshll.u32 %s4474_s12, 4  ;;  %s4475_s17 = smov 128   ;;  %s37_s13 = int_to_ptr.vmem [resolvable:$true] %s36_s13 }
   0x6   :  { %s4476_s18 = smov 8   ;;  %s4477_s19 = smov [#allocation8]  }
   0x7   :  { %42 = dma.hbm_to_vmem [thread:$0]  %s35_s11, 4096, %s37_s13, [#allocation6], %s4475_s17, %s4475_s17, %s4476_s18  }
   0x8   :  { %s64_s20 = sshll.u32 %s4477_s19, 4  ;;  %s24_s22 = sshll.u32 %s4660_s0, 4  ;;  %s65_s20 = int_to_ptr.vmem [resolvable:$true] %s64_s20  ;;  %s25_s22 = int_to_ptr.hbm [resolvable:$true] %s24_s22 }
   0x9   :  { %70 = dma.hbm_to_vmem [thread:$0]  %s63_s16, 4096, %s65_s20, [#allocation9], %s4475_s17, %s4475_s17, %s4476_s18  }
   0xa   :  { %s47_s24 = sshll.u32 %s4662_s2, 4  ;;  %s4478_s25 = smov [#allocation2]   ;;  %s48_s24 = int_to_ptr.hbm [resolvable:$true] %s47_s24 }
   0xb   :  { %s26_s26 = sshll.u32 %s4478_s25, 4  ;;  %s4479_s27 = smov [#allocation7]   ;;  %s27_s26 = int_to_ptr.vmem [resolvable:$true] %s26_s26 }
   0xc   :  { %29 = dma.hbm_to_vmem [thread:$0]  %s25_s22, 32, %s27_s26, [#allocation3]  }
   0xd   :  { %s49_s28 = sshll.u32 %s4479_s27, 4  ;;  %s77_s0 = sshll.u32 %s4666_s6, 4  ;;  %s50_s28 = int_to_ptr.vmem [resolvable:$true] %s49_s28  ;;  %s78_s0 = int_to_ptr.hbm [resolvable:$true] %s77_s0 }
   0xe   :  { %55 = dma.hbm_to_vmem [thread:$0]  %s48_s24, 4096, %s50_s28, [#allocation6], %s4475_s17, %s4475_s17, %s4476_s18  }
   0xf   :  { %s93_s2 = sshll.u32 %s4668_s8, 4  ;;  %s4480_s12 = smov [#allocation10]   ;;  %s94_s2 = int_to_ptr.hbm [resolvable:$true] %s93_s2 }
  0x10   :  { %s79_s13 = sshll.u32 %s4480_s12, 4  ;;  %s4481_s14 = smov [#allocation11]   ;;  %s80_s13 = int_to_ptr.vmem [resolvable:$true] %s79_s13 }
  0x11   :  { %85 = dma.hbm_to_vmem [thread:$0]  %s78_s0, 4096, %s80_s13, [#allocation9], %s4475_s17, %s4475_s17, %s4476_s18  }
  0x12   :  { %s95_s6 = sshll.u32 %s4481_s14, 4  ;;  %s96_s6 = int_to_ptr.vmem [resolvable:$true] %s95_s6 }
  0x13   :  { %98 = dma.hbm_to_vmem [thread:$0]  %s94_s2, 32, %s96_s6, [#allocation12]  }
  0x14   :  { %4464 = dma.done.wait [#allocation3], 32  }
  0x15   :  { %4465 = vsyncadd [#allocation3], 4294967264 }
  0x16   :  { %4466 = dma.done.wait [#allocation6], 8192  }
  0x17   :  { %4467 = vsyncadd [#allocation6], 4294959104 }
  0x18   :  { %4468 = dma.done.wait [#allocation9], 8192  }
  0x19   :  { %4469 = vsyncadd [#allocation9], 4294959104 }
  0x1a   :  { %4470 = dma.done.wait [#allocation12], 32  }
  0x1b   :  { %4471 = vsyncadd [#allocation12], 4294967264  ;;  %v2743_v0 = vld [vmem:[#allocation5 + $0x70] sm:$0xf]  ;;  %v3980_v1 = vld [vmem:[#allocation5 + $0x74] sm:$0xf0] }
  0x1c   :  { %v2807_v2 = vld [vmem:[#allocation5 + $0xf0] sm:$0xf]  ;;  %v2744_v3 = vor.u32 %v3980_v1, %v2743_v0  ;;  %v3996_v4 = vld [vmem:[#allocation5 + $0xf4] sm:$0xf0]  ;;  %v3979_v5 = vld [vmem:[#allocation5 + $0x74] sm:$0xf] }
  0x1d   :  { %v2745_v6 = vld [vmem:[#allocation5 + $0x78] sm:$0xf0]  ;;  %v2808_v7 = vor.u32 %v3996_v4, %v2807_v2  ;;  %v3995_v9 = vld [vmem:[#allocation5 + $0xf4] sm:$0xf]  ;;  %v2735_v11 = vld [vmem:[#allocation5 + $0x60] sm:$0xf] }
  0x1e   :  { %v2748_v8 = vor.u32 %v3979_v5, %v2745_v6  ;;  %v2809_v10 = vld [vmem:[#allocation5 + $0xf8] sm:$0xf0]  ;;  %328 = vmatpush.bf16.msra.mxu0 %v2744_v3  ;;  %v3978_v13 = vld [vmem:[#allocation5 + $0x64] sm:$0xf0]  ;;  %v2799_v14 = vld [vmem:[#allocation5 + $0xe0] sm:$0xf] }
  0x1f   :  { %v2812_v12 = vor.u32 %v3995_v9, %v2809_v10  ;;  %v3994_v15 = vld [vmem:[#allocation5 + $0xe4] sm:$0xf0]  ;;  %341 = vmatpush.bf16.msra.mxu1 %v2808_v7  ;;  %v2736_v16 = vor.u32 %v3978_v13, %v2735_v11  ;;  %v3977_v18 = vld [vmem:[#allocation5 + $0x64] sm:$0xf]  ;;  %v2737_v19 = vld [vmem:[#allocation5 + $0x68] sm:$0xf0] }
  0x20   :  { %354 = vmatpush.bf16.msra.mxu2 %v2748_v8  ;;  %v2800_v17 = vor.u32 %v3994_v15, %v2799_v14  ;;  %v3993_v20 = vld [vmem:[#allocation5 + $0xe4] sm:$0xf]  ;;  %v2740_v21 = vor.u32 %v3977_v18, %v2737_v19  ;;  %v2801_v22 = vld [vmem:[#allocation5 + $0xe8] sm:$0xf0]  ;;  %v2727_v23 = vld [vmem:[#allocation5 + $0x50] sm:$0xf] }
  0x21   :  { %367 = vmatpush.bf16.msra.mxu3 %v2812_v12  ;;  %v3976_v24 = vld [vmem:[#allocation5 + $0x54] sm:$0xf0]  ;;  %v2804_v25 = vor.u32 %v3993_v20, %v2801_v22  ;;  %v2791_v26 = vld [vmem:[#allocation5 + $0xd0] sm:$0xf]  ;;  %v3975_v28 = vld [vmem:[#allocation5 + $0x54] sm:$0xf] }
  0x22   :  { %v3992_v27 = vld [vmem:[#allocation5 + $0xd4] sm:$0xf0]  ;;  %329 = vmatpush.bf16.msra.mxu0 %v2736_v16  ;;  %v2728_v29 = vor.u32 %v3976_v24, %v2727_v23  ;;  %v2729_v30 = vld [vmem:[#allocation5 + $0x58] sm:$0xf0]  ;;  %v3991_v31 = vld [vmem:[#allocation5 + $0xd4] sm:$0xf] }
  0x23   :  { %v2793_v32 = vld [vmem:[#allocation5 + $0xd8] sm:$0xf0]  ;;  %342 = vmatpush.bf16.msra.mxu1 %v2800_v17  ;;  %v2792_v33 = vor.u32 %v3992_v27, %v2791_v26  ;;  %v2732_v34 = vor.u32 %v3975_v28, %v2729_v30  ;;  %v2719_v35 = vld [vmem:[#allocation5 + $0x40] sm:$0xf]  ;;  %v3974_v36 = vld [vmem:[#allocation5 + $0x44] sm:$0xf0] }
  0x24   :  { %355 = vmatpush.bf16.msra.mxu2 %v2740_v21  ;;  %v2783_v37 = vld [vmem:[#allocation5 + $0xc0] sm:$0xf]  ;;  %v2796_v38 = vor.u32 %v3991_v31, %v2793_v32  ;;  %v3990_v39 = vld [vmem:[#allocation5 + $0xc4] sm:$0xf0]  ;;  %v3973_v40 = vld [vmem:[#allocation5 + $0x44] sm:$0xf]  ;;  %v2720_v44 = vor.u32 %v3974_v36, %v2719_v35 }
  0x25   :  { %368 = vmatpush.bf16.msra.mxu3 %v2804_v25  ;;  %v2721_v41 = vld [vmem:[#allocation5 + $0x48] sm:$0xf0]  ;;  %v3989_v42 = vld [vmem:[#allocation5 + $0xc4] sm:$0xf]  ;;  %v2784_v45 = vor.u32 %v3990_v39, %v2783_v37  ;;  %v2711_v47 = vld [vmem:[#allocation5 + $0x30] sm:$0xf] }
  0x26   :  { %v2785_v43 = vld [vmem:[#allocation5 + $0xc8] sm:$0xf0]  ;;  %330 = vmatpush.bf16.msra.mxu0 %v2728_v29  ;;  %v2724_v46 = vor.u32 %v3973_v40, %v2721_v41  ;;  %v3972_v48 = vld [vmem:[#allocation5 + $0x34] sm:$0xf0]  ;;  %v2775_v49 = vld [vmem:[#allocation5 + $0xb0] sm:$0xf] }
  0x27   :  { %343 = vmatpush.bf16.msra.mxu1 %v2792_v33  ;;  %v2788_v50 = vor.u32 %v3989_v42, %v2785_v43  ;;  %v3988_v51 = vld [vmem:[#allocation5 + $0xb4] sm:$0xf0]  ;;  %v3971_v52 = vld [vmem:[#allocation5 + $0x34] sm:$0xf]  ;;  %v2713_v53 = vld [vmem:[#allocation5 + $0x38] sm:$0xf0]  ;;  %v2712_v56 = vor.u32 %v3972_v48, %v2711_v47 }
  0x28   :  { %356 = vmatpush.bf16.msra.mxu2 %v2732_v34  ;;  %v3987_v54 = vld [vmem:[#allocation5 + $0xb4] sm:$0xf]  ;;  %v2777_v55 = vld [vmem:[#allocation5 + $0xb8] sm:$0xf0]  ;;  %v2776_v57 = vor.u32 %v3988_v51, %v2775_v49  ;;  %v2716_v58 = vor.u32 %v3971_v52, %v2713_v53  ;;  %v2703_v59 = vld [vmem:[#allocation5 + $0x20] sm:$0xf] }
  0x29   :  { %369 = vmatpush.bf16.msra.mxu3 %v2796_v38  ;;  %v3970_v60 = vld [vmem:[#allocation5 + $0x24] sm:$0xf0]  ;;  %v2767_v61 = vld [vmem:[#allocation5 + $0xa0] sm:$0xf]  ;;  %v2780_v62 = vor.u32 %v3987_v54, %v2777_v55  ;;  %v3969_v0 = vld [vmem:[#allocation5 + $0x24] sm:$0xf] }
  0x2a   :  { %331 = vmatpush.bf16.msra.mxu0 %v2720_v44  ;;  %v3986_v63 = vld [vmem:[#allocation5 + $0xa4] sm:$0xf0]  ;;  %v2705_v1 = vld [vmem:[#allocation5 + $0x28] sm:$0xf0]  ;;  %v3985_v2 = vld [vmem:[#allocation5 + $0xa4] sm:$0xf]  ;;  %v2704_v4 = vor.u32 %v3970_v60, %v2703_v59 }
  0x2b   :  { %344 = vmatpush.bf16.msra.mxu1 %v2784_v45  ;;  %v2769_v3 = vld [vmem:[#allocation5 + $0xa8] sm:$0xf0]  ;;  %v2768_v5 = vor.u32 %v3986_v63, %v2767_v61  ;;  %v2708_v6 = vor.u32 %v3969_v0, %v2705_v1  ;;  %v2695_v7 = vld [vmem:[#allocation5 + $0x10] sm:$0xf]  ;;  %v3968_v8 = vld [vmem:[#allocation5 + $0x14] sm:$0xf0] }
  0x2c   :  { %357 = vmatpush.bf16.msra.mxu2 %v2724_v46  ;;  %v2759_v9 = vld [vmem:[#allocation5 + $0x90] sm:$0xf]  ;;  %v2772_v10 = vor.u32 %v3985_v2, %v2769_v3  ;;  %v3984_v11 = vld [vmem:[#allocation5 + $0x94] sm:$0xf0]  ;;  %v3967_v12 = vld [vmem:[#allocation5 + $0x14] sm:$0xf]  ;;  %v2696_v17 = vor.u32 %v3968_v8, %v2695_v7 }
  0x2d   :  { %370 = vmatpush.bf16.msra.mxu3 %v2788_v50  ;;  %v2697_v13 = vld [vmem:[#allocation5 + $0x18] sm:$0xf0]  ;;  %v3983_v14 = vld [vmem:[#allocation5 + $0x94] sm:$0xf]  ;;  %v2687_v16 = vld [vmem:[#allocation5] sm:$0xf]  ;;  %v2760_v21 = vor.u32 %v3984_v11, %v2759_v9 }
  0x2e   :  { %332 = vmatpush.bf16.msra.mxu0 %v2712_v56  ;;  %v2761_v15 = vld [vmem:[#allocation5 + $0x98] sm:$0xf0]  ;;  %v3966_v18 = vld [vmem:[#allocation5 + $0x4] sm:$0xf0]  ;;  %v2751_v19 = vld [vmem:[#allocation5 + $0x80] sm:$0xf]  ;;  %v2700_v22 = vor.u32 %v3967_v12, %v2697_v13 }
  0x2f   :  { %345 = vmatpush.bf16.msra.mxu1 %v2776_v57  ;;  %v3982_v20 = vld [vmem:[#allocation5 + $0x84] sm:$0xf0]  ;;  %v3965_v23 = vld [vmem:[#allocation5 + $0x4] sm:$0xf]  ;;  %v2689_v24 = vld [vmem:[#allocation5 + $0x8] sm:$0xf0]  ;;  %v2764_v26 = vor.u32 %v3983_v14, %v2761_v15  ;;  %v2688_v33 = vor.u32 %v3966_v18, %v2687_v16 }
  0x30   :  { %358 = vmatpush.bf16.msra.mxu2 %v2716_v58  ;;  %v3981_v25 = vld [vmem:[#allocation5 + $0x84] sm:$0xf]  ;;  %v2753_v27 = vld [vmem:[#allocation5 + $0x88] sm:$0xf0]  ;;  %v2871_v28 = vld [vmem:[#allocation7 + $0x70] sm:$0xf]  ;;  %v2752_v36 = vor.u32 %v3982_v20, %v2751_v19  ;;  %v2692_v37 = vor.u32 %v3965_v23, %v2689_v24 }
  0x31   :  { %371 = vmatpush.bf16.msra.mxu3 %v2780_v62  ;;  %v4012_v29 = vld [vmem:[#allocation7 + $0x74] sm:$0xf0]  ;;  %v2935_v30 = vld [vmem:[#allocation7 + $0xf0] sm:$0xf]  ;;  %v123_v32 = vld [vmem:[#allocation2] sm:$0x3]  ;;  %v2756_v40 = vor.u32 %v3981_v25, %v2753_v27 }
  0x32   :  { %333 = vmatpush.bf16.msra.mxu0 %v2704_v4  ;;  %v4028_v31 = vld [vmem:[#allocation7 + $0xf4] sm:$0xf0]  ;;  %v4011_v34 = vld [vmem:[#allocation7 + $0x74] sm:$0xf]  ;;  %v2873_v35 = vld [vmem:[#allocation7 + $0x78] sm:$0xf0]  ;;  %v2872_v41 = vor.u32 %v4012_v29, %v2871_v28 }
  0x33   :  { %346 = vmatpush.bf16.msra.mxu1 %v2768_v5  ;;  %163 = vst [vmem:[#allocation1] ss:$9 sm:$0xff] %v123_v32  ;;  %v4027_v38 = vld [vmem:[#allocation7 + $0xf4] sm:$0xf]  ;;  %v2937_v39 = vld [vmem:[#allocation7 + $0xf8] sm:$0xf0]  ;;  %v2936_v42 = vor.u32 %v4028_v31, %v2935_v30  ;;  %v2876_v43 = vor.u32 %v4011_v34, %v2873_v35 }
  0x34   :  { %359 = vmatpush.bf16.msra.mxu2 %v2708_v6  ;;  %v2863_v44 = vld [vmem:[#allocation7 + $0x60] sm:$0xf]  ;;  %v4010_v45 = vld [vmem:[#allocation7 + $0x64] sm:$0xf0]  ;;  %v2940_v47 = vor.u32 %v4027_v38, %v2937_v39  ;;  %v4009_v49 = vld [vmem:[#allocation7 + $0x64] sm:$0xf] }
  0x35   :  { %372 = vmatpush.bf16.msra.mxu3 %v2772_v10  ;;  %v2927_v46 = vld [vmem:[#allocation7 + $0xe0] sm:$0xf]  ;;  %v4026_v48 = vld [vmem:[#allocation7 + $0xe4] sm:$0xf0]  ;;  %v2865_v50 = vld [vmem:[#allocation7 + $0x68] sm:$0xf0]  ;;  %v2864_v53 = vor.u32 %v4010_v45, %v2863_v44 }
  0x36   :  { %334 = vmatpush.bf16.msra.mxu0 %v2696_v17  ;;  %v4025_v51 = vld [vmem:[#allocation7 + $0xe4] sm:$0xf]  ;;  %v2929_v52 = vld [vmem:[#allocation7 + $0xe8] sm:$0xf0]  ;;  %v2855_v54 = vld [vmem:[#allocation7 + $0x50] sm:$0xf]  ;;  %v2928_v56 = vor.u32 %v4026_v48, %v2927_v46  ;;  %v2868_v57 = vor.u32 %v4009_v49, %v2865_v50 }
  0x37   :  { %347 = vmatpush.bf16.msra.mxu1 %v2760_v21  ;;  %v4008_v55 = vld [vmem:[#allocation7 + $0x54] sm:$0xf0]  ;;  %v2919_v60 = vld [vmem:[#allocation7 + $0xd0] sm:$0xf]  ;;  %v2932_v61 = vor.u32 %v4025_v51, %v2929_v52  ;;  %v4007_v63 = vld [vmem:[#allocation7 + $0x54] sm:$0xf] }
  0x38   :  { %360 = vmatpush.bf16.msra.mxu2 %v2700_v22  ;;  %v4024_v62 = vld [vmem:[#allocation7 + $0xd4] sm:$0xf0]  ;;  %v2857_v0 = vld [vmem:[#allocation7 + $0x58] sm:$0xf0]  ;;  %v4023_v1 = vld [vmem:[#allocation7 + $0xd4] sm:$0xf]  ;;  %v2856_v3 = vor.u32 %v4008_v55, %v2855_v54 }
  0x39   :  { %373 = vmatpush.bf16.msra.mxu3 %v2764_v26  ;;  %v2921_v2 = vld [vmem:[#allocation7 + $0xd8] sm:$0xf0]  ;;  %v2920_v4 = vor.u32 %v4024_v62, %v2919_v60  ;;  %v2860_v5 = vor.u32 %v4007_v63, %v2857_v0  ;;  %v2847_v6 = vld [vmem:[#allocation7 + $0x40] sm:$0xf]  ;;  %v4006_v7 = vld [vmem:[#allocation7 + $0x44] sm:$0xf0] }
  0x3a   :  { %335 = vmatpush.bf16.msra.mxu0 %v2688_v33  ;;  %v164_v58 = vld [vmem:[#allocation1] sm:$0xff]  ;;  %v165_v59 = vld [vmem:[#allocation1 + $0x9] sm:$0xff]  ;;  %v2924_v9 = vor.u32 %v4023_v1, %v2921_v2  ;;  %v4022_v10 = vld [vmem:[#allocation7 + $0xc4] sm:$0xf0]  ;;  %v2848_v15 = vor.u32 %v4006_v7, %v2847_v6  ;;  %vm1149_vm0 = vcmask 1041408   ;;  %s2669_s21 = sshll.u32 %s4669_s9, 4  ;;  %s2670_s21 = int_to_ptr.hbm [resolvable:$true] %s2669_s21 }
  0x3b   :  { %348 = vmatpush.bf16.msra.mxu1 %v2752_v36  ;;  %v2911_v8 = vld [vmem:[#allocation7 + $0xc0] sm:$0xf]  ;;  %v4005_v11 = vld [vmem:[#allocation7 + $0x44] sm:$0xf]  ;;  %v2849_v12 = vld [vmem:[#allocation7 + $0x48] sm:$0xf0] }
  0x3c   :  { %361 = vmatpush.bf16.msra.mxu2 %v2692_v37  ;;  %v4021_v13 = vld [vmem:[#allocation7 + $0xc4] sm:$0xf]  ;;  %v2913_v14 = vld [vmem:[#allocation7 + $0xc8] sm:$0xf0]  ;;  %v2912_v16 = vor.u32 %v4022_v10, %v2911_v8  ;;  %v2852_v17 = vor.u32 %v4005_v11, %v2849_v12  ;;  %v2839_v18 = vld [vmem:[#allocation7 + $0x30] sm:$0xf] }
  0x3d   :  { %374 = vmatpush.bf16.msra.mxu3 %v2756_v40  ;;  %336 = vmatmul.bf16.vlgmr.msra.gmra.mxu0 %v164_v58  ;;  %v4004_v19 = vld [vmem:[#allocation7 + $0x34] sm:$0xf0]  ;;  %v2903_v20 = vld [vmem:[#allocation7 + $0xb0] sm:$0xf]  ;;  %v2916_v21 = vor.u32 %v4021_v13, %v2913_v14  ;;  %v4003_v23 = vld [vmem:[#allocation7 + $0x34] sm:$0xf] }
  0x3e   :  { %582 = vmatpush.bf16.msrb.mxu0 %v2872_v41  ;;  %349 = vmatmul.bf16.vlgmr.msra.gmra.mxu1 %v165_v59  ;;  %v4020_v22 = vld [vmem:[#allocation7 + $0xb4] sm:$0xf0]  ;;  %v2841_v24 = vld [vmem:[#allocation7 + $0x38] sm:$0xf0]  ;;  %v4019_v25 = vld [vmem:[#allocation7 + $0xb4] sm:$0xf]  ;;  %v2840_v27 = vor.u32 %v4004_v19, %v2839_v18 }
  0x3f   :  { %595 = vmatpush.bf16.msrb.mxu1 %v2936_v42  ;;  %362 = vmatmul.bf16.vlgmr.msra.gmra.mxu2 %v164_v58  ;;  %v2905_v26 = vld [vmem:[#allocation7 + $0xb8] sm:$0xf0]  ;;  %v2904_v28 = vor.u32 %v4020_v22, %v2903_v20  ;;  %v2844_v29 = vor.u32 %v4003_v23, %v2841_v24  ;;  %v2831_v30 = vld [vmem:[#allocation7 + $0x20] sm:$0xf]  ;;  %v4002_v31 = vld [vmem:[#allocation7 + $0x24] sm:$0xf0] }
  0x40   :  { %608 = vmatpush.bf16.msrb.mxu2 %v2876_v43  ;;  %375 = vmatmul.bf16.vlgmr.msra.gmra.mxu3 %v165_v59  ;;  %v2895_v32 = vld [vmem:[#allocation7 + $0xa0] sm:$0xf]  ;;  %v2908_v33 = vor.u32 %v4019_v25, %v2905_v26  ;;  %v4018_v34 = vld [vmem:[#allocation7 + $0xa4] sm:$0xf0]  ;;  %v4001_v35 = vld [vmem:[#allocation7 + $0x24] sm:$0xf]  ;;  %v2832_v39 = vor.u32 %v4002_v31, %v2831_v30 }
  0x41   :  { %621 = vmatpush.bf16.msrb.mxu3 %v2940_v47  ;;  %v2833_v36 = vld [vmem:[#allocation7 + $0x28] sm:$0xf0]  ;;  %v4017_v37 = vld [vmem:[#allocation7 + $0xa4] sm:$0xf]  ;;  %v2896_v40 = vor.u32 %v4018_v34, %v2895_v32  ;;  %v2823_v42 = vld [vmem:[#allocation7 + $0x10] sm:$0xf] }
  0x42   :  { %583 = vmatpush.bf16.msrb.mxu0 %v2864_v53  ;;  %v2897_v38 = vld [vmem:[#allocation7 + $0xa8] sm:$0xf0]  ;;  %v2836_v41 = vor.u32 %v4001_v35, %v2833_v36  ;;  %v4000_v43 = vld [vmem:[#allocation7 + $0x14] sm:$0xf0]  ;;  %v2887_v44 = vld [vmem:[#allocation7 + $0x90] sm:$0xf] }
  0x43   :  { %596 = vmatpush.bf16.msrb.mxu1 %v2928_v56  ;;  %v2900_v45 = vor.u32 %v4017_v37, %v2897_v38  ;;  %v4016_v46 = vld [vmem:[#allocation7 + $0x94] sm:$0xf0]  ;;  %v3999_v47 = vld [vmem:[#allocation7 + $0x14] sm:$0xf]  ;;  %v2825_v48 = vld [vmem:[#allocation7 + $0x18] sm:$0xf0]  ;;  %v2824_v51 = vor.u32 %v4000_v43, %v2823_v42 }
  0x44   :  { %609 = vmatpush.bf16.msrb.mxu2 %v2868_v57  ;;  %v4015_v49 = vld [vmem:[#allocation7 + $0x94] sm:$0xf]  ;;  %v2889_v50 = vld [vmem:[#allocation7 + $0x98] sm:$0xf0]  ;;  %v2815_v52 = vld [vmem:[#allocation7] sm:$0xf]  ;;  %v2888_v55 = vor.u32 %v4016_v46, %v2887_v44  ;;  %v2828_v56 = vor.u32 %v3999_v47, %v2825_v48 }
  0x45   :  { %622 = vmatpush.bf16.msrb.mxu3 %v2932_v61  ;;  %v3998_v53 = vld [vmem:[#allocation7 + $0x4] sm:$0xf0]  ;;  %v382_v54 = vld [vmem:[#allocation11] sm:$0x3]  ;;  %v3997_v59 = vld [vmem:[#allocation7 + $0x4] sm:$0xf]  ;;  %v2892_v60 = vor.u32 %v4015_v49, %v2889_v50 }
  0x46   :  { %584 = vmatpush.bf16.msrb.mxu0 %v2856_v3  ;;  %v2879_v57 = vld [vmem:[#allocation7 + $0x80] sm:$0xf]  ;;  %v4014_v58 = vld [vmem:[#allocation7 + $0x84] sm:$0xf0]  ;;  %v2817_v61 = vld [vmem:[#allocation7 + $0x8] sm:$0xf0]  ;;  %v2816_v3 = vor.u32 %v3998_v53, %v2815_v52 }
  0x47   :  { %597 = vmatpush.bf16.msrb.mxu1 %v2920_v4  ;;  %v4013_v62 = vld [vmem:[#allocation7 + $0x84] sm:$0xf]  ;;  %v2881_v63 = vld [vmem:[#allocation7 + $0x88] sm:$0xf0]  ;;  %v4565_v0 = vperm.slane %v382_v54, 0  ;;  %v4567_v4 = vperm.slane %v382_v54, 1  ;;  %v2880_v7 = vor.u32 %v4014_v58, %v2879_v57  ;;  %v2820_v8 = vor.u32 %v3997_v59, %v2817_v61 }
  0x48   :  { %610 = vmatpush.bf16.msrb.mxu2 %v2860_v5  ;;  %v2999_v1 = vld [vmem:[#allocation8 + $0x70] sm:$0xf]  ;;  %v4044_v2 = vld [vmem:[#allocation8 + $0x74] sm:$0xf0]  ;;  %v4043_v5 = vld [vmem:[#allocation8 + $0x74] sm:$0xf] }
  0x49   :  { %623 = vmatpush.bf16.msrb.mxu3 %v2924_v9  ;;  %v3001_v6 = vld [vmem:[#allocation8 + $0x78] sm:$0xf0]  ;;  %v2884_v9 = vor.u32 %v4013_v62, %v2881_v63  ;;  %v3000_v10 = vor.u32 %v4044_v2, %v2999_v1  ;;  %v388_v11 = vpack.c.bf16 %v4565_v0, %v4565_v0  ;;  %v389_v13 = vpack.c.bf16 %v4567_v4, %v4567_v4  ;;  %v2991_v14 = vld [vmem:[#allocation8 + $0x60] sm:$0xf]  ;;  %v2993_v18 = vld [vmem:[#allocation8 + $0x68] sm:$0xf0] }
  0x4a   :  { %585 = vmatpush.bf16.msrb.mxu0 %v2848_v15  ;;  %v3004_v12 = vor.u32 %v4043_v5, %v3001_v6  ;;  %v4042_v15 = vld [vmem:[#allocation8 + $0x64] sm:$0xf0]  ;;  %v3063_v19 = vld [vmem:[#allocation8 + $0xf0] sm:$0xf]  ;;  %v4060_v20 = vld [vmem:[#allocation8 + $0xf4] sm:$0xf0] }
  0x4b   :  { %598 = vmatpush.bf16.msrb.mxu1 %v2912_v16  ;;  %v4041_v16 = vld [vmem:[#allocation8 + $0x64] sm:$0xf]  ;;  %v3064_v22 = vor.u32 %v4060_v20, %v3063_v19  ;;  %v4059_v23 = vld [vmem:[#allocation8 + $0xf4] sm:$0xf]  ;;  %v3065_v24 = vld [vmem:[#allocation8 + $0xf8] sm:$0xf0] }
  0x4c   :  { %611 = vmatpush.bf16.msrb.mxu2 %v2852_v17  ;;  %v2992_v17 = vor.u32 %v4042_v15, %v2991_v14  ;;  %v2983_v25 = vld [vmem:[#allocation8 + $0x50] sm:$0xf]  ;;  %v3068_v26 = vor.u32 %v4059_v23, %v3065_v24  ;;  %v3055_v32 = vld [vmem:[#allocation8 + $0xe0] sm:$0xf]  ;;  %v4057_v34 = vld [vmem:[#allocation8 + $0xe4] sm:$0xf] }
  0x4d   :  { %624 = vmatpush.bf16.msrb.mxu3 %v2916_v21  ;;  %v2996_v21 = vor.u32 %v4041_v16, %v2993_v18  ;;  %v3057_v36 = vld [vmem:[#allocation8 + $0xe8] sm:$0xf0]  ;;  %v2975_v38 = vld [vmem:[#allocation8 + $0x40] sm:$0xf]  ;;  %v3047_v43 = vld [vmem:[#allocation8 + $0xd0] sm:$0xf] }
  0x4e   :  { %586 = vmatpush.bf16.msrb.mxu0 %v2840_v27  ;;  %v4040_v27 = vld [vmem:[#allocation8 + $0x54] sm:$0xf0]  ;;  %v3060_v37 = vor.u32 %v4057_v34, %v3057_v36  ;;  %v2977_v42 = vld [vmem:[#allocation8 + $0x48] sm:$0xf0]  ;;  %v4055_v47 = vld [vmem:[#allocation8 + $0xd4] sm:$0xf] }
  0x4f   :  { %599 = vmatpush.bf16.msrb.mxu1 %v2904_v28  ;;  %v4039_v28 = vld [vmem:[#allocation8 + $0x54] sm:$0xf]  ;;  %v2984_v30 = vor.u32 %v4040_v27, %v2983_v25  ;;  %v4056_v44 = vld [vmem:[#allocation8 + $0xd4] sm:$0xf0]  ;;  %v3049_v48 = vld [vmem:[#allocation8 + $0xd8] sm:$0xf0] }
  0x50   :  { %612 = vmatpush.bf16.msrb.mxu2 %v2844_v29  ;;  %v2985_v29 = vld [vmem:[#allocation8 + $0x58] sm:$0xf0]  ;;  %v3048_v46 = vor.u32 %v4056_v44, %v3047_v43  ;;  %v2967_v49 = vld [vmem:[#allocation8 + $0x30] sm:$0xf]  ;;  %v3052_v50 = vor.u32 %v4055_v47, %v3049_v48  ;;  %v4035_v52 = vld [vmem:[#allocation8 + $0x34] sm:$0xf] }
  0x51   :  { %625 = vmatpush.bf16.msrb.mxu3 %v2908_v33  ;;  %v2988_v31 = vor.u32 %v4039_v28, %v2985_v29  ;;  %v4058_v33 = vld [vmem:[#allocation8 + $0xe4] sm:$0xf0]  ;;  %v2969_v53 = vld [vmem:[#allocation8 + $0x38] sm:$0xf0]  ;;  %v3039_v54 = vld [vmem:[#allocation8 + $0xc0] sm:$0xf] }
  0x52   :  { %587 = vmatpush.bf16.msrb.mxu0 %v2832_v39  ;;  %v3056_v35 = vor.u32 %v4058_v33, %v3055_v32  ;;  %v4038_v39 = vld [vmem:[#allocation8 + $0x44] sm:$0xf0]  ;;  %v3041_v58 = vld [vmem:[#allocation8 + $0xc8] sm:$0xf0]  ;;  %v2972_v59 = vor.u32 %v4035_v52, %v2969_v53  ;;  %v2959_v61 = vld [vmem:[#allocation8 + $0x20] sm:$0xf] }
  0x53   :  { %600 = vmatpush.bf16.msrb.mxu1 %v2896_v40  ;;  %v4037_v40 = vld [vmem:[#allocation8 + $0x44] sm:$0xf]  ;;  %v4034_v62 = vld [vmem:[#allocation8 + $0x24] sm:$0xf0]  ;;  %v2961_v2 = vld [vmem:[#allocation8 + $0x28] sm:$0xf0] }
  0x54   :  { %613 = vmatpush.bf16.msrb.mxu2 %v2836_v41  ;;  %v2976_v41 = vor.u32 %v4038_v39, %v2975_v38  ;;  %v4033_v1 = vld [vmem:[#allocation8 + $0x24] sm:$0xf]  ;;  %v3031_v6 = vld [vmem:[#allocation8 + $0xb0] sm:$0xf]  ;;  %v4031_v14 = vld [vmem:[#allocation8 + $0x14] sm:$0xf] }
  0x55   :  { %626 = vmatpush.bf16.msrb.mxu3 %v2900_v45  ;;  %v2980_v45 = vor.u32 %v4037_v40, %v2977_v42  ;;  %v2964_v5 = vor.u32 %v4033_v1, %v2961_v2  ;;  %v2953_v16 = vld [vmem:[#allocation8 + $0x18] sm:$0xf0]  ;;  %v3023_v18 = vld [vmem:[#allocation8 + $0xa0] sm:$0xf]  ;;  %v4050_v19 = vld [vmem:[#allocation8 + $0xa4] sm:$0xf0] }
  0x56   :  { %588 = vmatpush.bf16.msrb.mxu0 %v2824_v51  ;;  %v4036_v51 = vld [vmem:[#allocation8 + $0x34] sm:$0xf0]  ;;  %v4049_v20 = vld [vmem:[#allocation8 + $0xa4] sm:$0xf]  ;;  %v3025_v23 = vld [vmem:[#allocation8 + $0xa8] sm:$0xf0] }
  0x57   :  { %601 = vmatpush.bf16.msrb.mxu1 %v2888_v55  ;;  %v4054_v55 = vld [vmem:[#allocation8 + $0xc4] sm:$0xf0]  ;;  %v2968_v57 = vor.u32 %v4036_v51, %v2967_v49  ;;  %v3028_v25 = vor.u32 %v4049_v20, %v3025_v23  ;;  %v4029_v28 = vld [vmem:[#allocation8 + $0x4] sm:$0xf]  ;;  %v3015_v32 = vld [vmem:[#allocation8 + $0x90] sm:$0xf] }
  0x58   :  { %614 = vmatpush.bf16.msrb.mxu2 %v2828_v56  ;;  %v4053_v56 = vld [vmem:[#allocation8 + $0xc4] sm:$0xf]  ;;  %v4030_v27 = vld [vmem:[#allocation8 + $0x4] sm:$0xf0]  ;;  %v4048_v33 = vld [vmem:[#allocation8 + $0x94] sm:$0xf0] }
  0x59   :  { %627 = vmatpush.bf16.msrb.mxu3 %v2892_v60  ;;  %v3040_v60 = vor.u32 %v4054_v55, %v3039_v54  ;;  %v3044_v63 = vor.u32 %v4053_v56, %v3041_v58  ;;  %v4047_v34 = vld [vmem:[#allocation8 + $0x94] sm:$0xf]  ;;  %v3017_v36 = vld [vmem:[#allocation8 + $0x98] sm:$0xf0]  ;;  %v3007_v40 = vld [vmem:[#allocation8 + $0x80] sm:$0xf] }
  0x5a   :  { %589 = vmatpush.bf16.msrb.mxu0 %v2816_v3  ;;  %v2960_v3 = vor.u32 %v4034_v62, %v2959_v61  ;;  %v3020_v38 = vor.u32 %v4047_v34, %v3017_v36  ;;  %v4045_v42 = vld [vmem:[#allocation8 + $0x84] sm:$0xf]  ;;  %v3127_v49 = vld [vmem:[#allocation10 + $0x70] sm:$0xf]  ;;  %v4075_v51 = vld [vmem:[#allocation10 + $0x74] sm:$0xf] }
  0x5b   :  { %602 = vmatpush.bf16.msrb.mxu1 %v2880_v7  ;;  %v4052_v7 = vld [vmem:[#allocation8 + $0xb4] sm:$0xf0]  ;;  %v3129_v54 = vld [vmem:[#allocation10 + $0x78] sm:$0xf0]  ;;  %v3119_v55 = vld [vmem:[#allocation10 + $0x60] sm:$0xf] }
  0x5c   :  { %615 = vmatpush.bf16.msrb.mxu2 %v2820_v8  ;;  %v4051_v8 = vld [vmem:[#allocation8 + $0xb4] sm:$0xf]  ;;  %v4074_v56 = vld [vmem:[#allocation10 + $0x64] sm:$0xf0]  ;;  %v3132_v58 = vor.u32 %v4075_v51, %v3129_v54  ;;  %v3191_v61 = vld [vmem:[#allocation10 + $0xf0] sm:$0xf] }
  0x5d   :  { %628 = vmatpush.bf16.msrb.mxu3 %v2884_v9  ;;  %590 = vmatmul.bf16.vlgmr.msrb.gmra.mxu0 %v388_v11  ;;  %v3032_v9 = vor.u32 %v4052_v7, %v3031_v6  ;;  %v3120_v62 = vor.u32 %v4074_v56, %v3119_v55  ;;  %v4091_v1 = vld [vmem:[#allocation10 + $0xf4] sm:$0xf]  ;;  %v3193_v2 = vld [vmem:[#allocation10 + $0xf8] sm:$0xf0]  ;;  %v3111_v7 = vld [vmem:[#allocation10 + $0x50] sm:$0xf] }
  0x5e   :  { %837 = vmatpush.bf16.msra.mxu0 %v3000_v10  ;;  %603 = vmatmul.bf16.vlgmr.msrb.gmra.mxu1 %v389_v13  ;;  %v3033_v10 = vld [vmem:[#allocation8 + $0xb8] sm:$0xf0]  ;;  %v3196_v6 = vor.u32 %v4091_v1, %v3193_v2  ;;  %v4070_v20 = vld [vmem:[#allocation10 + $0x44] sm:$0xf0]  ;;  %v3175_v23 = vld [vmem:[#allocation10 + $0xd0] sm:$0xf] }
  0x5f   :  { %616 = vmatmul.bf16.vlgmr.msrb.gmra.mxu2 %v388_v11  ;;  %850 = vmatpush.bf16.msra.mxu1 %v3064_v22  ;;  %v3036_v11 = vor.u32 %v4051_v8, %v3033_v10  ;;  %v3024_v22 = vor.u32 %v4050_v19, %v3023_v18  ;;  %v4072_v8 = vld [vmem:[#allocation10 + $0x54] sm:$0xf0]  ;;  %v3113_v10 = vld [vmem:[#allocation10 + $0x58] sm:$0xf0]  ;;  %v3103_v19 = vld [vmem:[#allocation10 + $0x40] sm:$0xf] }
  0x60   :  { %863 = vmatpush.bf16.msra.mxu2 %v3004_v12  ;;  %629 = vmatmul.bf16.vlgmr.msrb.gmra.mxu3 %v389_v13  ;;  %v2951_v12 = vld [vmem:[#allocation8 + $0x10] sm:$0xf]  ;;  %v4032_v13 = vld [vmem:[#allocation8 + $0x14] sm:$0xf0]  ;;  %v3169_v1 = vld [vmem:[#allocation10 + $0xc8] sm:$0xf0] }
  0x61   :  { %876 = vmatpush.bf16.msra.mxu3 %v3068_v26  ;;  %v2952_v15 = vor.u32 %v4032_v13, %v2951_v12  ;;  %v2943_v26 = vld [vmem:[#allocation8] sm:$0xf]  ;;  %v4090_v12 = vld [vmem:[#allocation10 + $0xe4] sm:$0xf0]  ;;  %v3095_v34 = vld [vmem:[#allocation10 + $0x30] sm:$0xf] }
  0x62   :  { %838 = vmatpush.bf16.msra.mxu0 %v2992_v17  ;;  %v2956_v17 = vor.u32 %v4031_v14, %v2953_v16  ;;  %v2944_v29 = vor.u32 %v4030_v27, %v2943_v26  ;;  %v4089_v14 = vld [vmem:[#allocation10 + $0xe4] sm:$0xf]  ;;  %v4087_v26 = vld [vmem:[#allocation10 + $0xd4] sm:$0xf]  ;;  %s4483_s1 = smov 64   ;;  %s4484_s22 = smov 4  }
  0x63   :  { %851 = vmatpush.bf16.msra.mxu1 %v3056_v35  ;;  %v3016_v35 = vor.u32 %v4048_v33, %v3015_v32  ;;  %v4069_v27 = vld [vmem:[#allocation10 + $0x44] sm:$0xf]  ;;  %v3104_v32 = vor.u32 %v4070_v20, %v3103_v19  ;;  %v3081_v19 = vld [vmem:[#allocation10 + $0x18] sm:$0xf0] }
  0x64   :  { %864 = vmatpush.bf16.msra.mxu2 %v2996_v21 }
  0x65   :  { %877 = vmatpush.bf16.msra.mxu3 %v3060_v37 }
  0x66   :  { %839 = vmatpush.bf16.msra.mxu0 %v2984_v30  ;;  %v2945_v30 = vld [vmem:[#allocation8 + $0x8] sm:$0xf0] }
  0x67   :  { %852 = vmatpush.bf16.msra.mxu1 %v3048_v46 }
  0x68   :  { %865 = vmatpush.bf16.msra.mxu2 %v2988_v31  ;;  %v2948_v31 = vor.u32 %v4029_v28, %v2945_v30  ;;  %v3105_v28 = vld [vmem:[#allocation10 + $0x48] sm:$0xf0] }
  0x69   :  { %878 = vmatpush.bf16.msra.mxu3 %v3052_v50  ;;  %v4076_v50 = vld [vmem:[#allocation10 + $0x74] sm:$0xf0]  ;;  %v3108_v33 = vor.u32 %v4069_v27, %v3105_v28  ;;  %v3153_v27 = vld [vmem:[#allocation10 + $0xa8] sm:$0xf0] }
  0x6a   :  { %840 = vmatpush.bf16.msra.mxu0 %v2976_v41  ;;  %v4046_v41 = vld [vmem:[#allocation8 + $0x84] sm:$0xf0]  ;;  %v3128_v53 = vor.u32 %v4076_v50, %v3127_v49 }
  0x6b   :  { %853 = vmatpush.bf16.msra.mxu1 %v3040_v60  ;;  %v3008_v44 = vor.u32 %v4046_v41, %v3007_v40  ;;  %v3121_v60 = vld [vmem:[#allocation10 + $0x68] sm:$0xf0]  ;;  %v3097_v40 = vld [vmem:[#allocation10 + $0x38] sm:$0xf0] }
  0x6c   :  { %866 = vmatpush.bf16.msra.mxu2 %v2980_v45  ;;  %v3009_v45 = vld [vmem:[#allocation8 + $0x88] sm:$0xf0] }
  0x6d   :  { %879 = vmatpush.bf16.msra.mxu3 %v3044_v63  ;;  %v3012_v47 = vor.u32 %v4045_v42, %v3009_v45  ;;  %v4092_v63 = vld [vmem:[#allocation10 + $0xf4] sm:$0xf0] }
  0x6e   :  { %841 = vmatpush.bf16.msra.mxu0 %v2968_v57  ;;  %v4584_v57 = vld [vmem:[%s4663_s3] sm:$0x3] }
  0x6f   :  { %854 = vmatpush.bf16.msra.mxu1 %v3032_v9  ;;  %v4071_v9 = vld [vmem:[#allocation10 + $0x54] sm:$0xf]  ;;  %v158_v16 = vperm.slane %v4584_v57, 0 }
  0x70   :  { %867 = vmatpush.bf16.msra.mxu2 %v2972_v59  ;;  %v4073_v59 = vld [vmem:[#allocation10 + $0x64] sm:$0xf] }
  0x71   :  { %880 = vmatpush.bf16.msra.mxu3 %v3036_v11  ;;  %v3183_v11 = vld [vmem:[#allocation10 + $0xe0] sm:$0xf] }
  0x72   :  { %842 = vmatpush.bf16.msra.mxu0 %v2960_v3  ;;  %v3124_v3 = vor.u32 %v4073_v59, %v3121_v60  ;;  %v3184_v13 = vor.u32 %v4090_v12, %v3183_v11  ;;  %v4083_v12 = vld [vmem:[#allocation10 + $0xb4] sm:$0xf] }
  0x73   :  { %855 = vmatpush.bf16.msra.mxu1 %v3024_v22  ;;  %v3116_v22 = vor.u32 %v4071_v9, %v3113_v10  ;;  %v4084_v9 = vld [vmem:[#allocation10 + $0xb4] sm:$0xf0] }
  0x74   :  { %868 = vmatpush.bf16.msra.mxu2 %v2964_v5  ;;  %v3192_v5 = vor.u32 %v4092_v63, %v3191_v61  ;;  %v4086_v61 = vld [vmem:[#allocation10 + $0xc4] sm:$0xf0] }
  0x75   :  { %881 = vmatpush.bf16.msra.mxu3 %v3028_v25  ;;  %v4088_v25 = vld [vmem:[#allocation10 + $0xd4] sm:$0xf0] }
  0x76   :  { %843 = vmatpush.bf16.msra.mxu0 %v2952_v15  ;;  %v3185_v15 = vld [vmem:[#allocation10 + $0xe8] sm:$0xf0]  ;;  %v3176_v30 = vor.u32 %v4088_v25, %v3175_v23  ;;  %v4082_v23 = vld [vmem:[#allocation10 + $0xa4] sm:$0xf0] }
  0x77   :  { %856 = vmatpush.bf16.msra.mxu1 %v3016_v35  ;;  %v3188_v18 = vor.u32 %v4089_v14, %v3185_v15  ;;  %v4068_v35 = vld [vmem:[#allocation10 + $0x34] sm:$0xf0]  ;;  %v3079_v15 = vld [vmem:[#allocation10 + $0x10] sm:$0xf] }
  0x78   :  { %869 = vmatpush.bf16.msra.mxu2 %v2956_v17  ;;  %v3112_v17 = vor.u32 %v4072_v8, %v3111_v7  ;;  %v3096_v42 = vor.u32 %v4068_v35, %v3095_v34  ;;  %v3089_v7 = vld [vmem:[#allocation10 + $0x28] sm:$0xf0]  ;;  %v3159_v8 = vld [vmem:[#allocation10 + $0xb0] sm:$0xf] }
  0x79   :  { %882 = vmatpush.bf16.msra.mxu3 %v3020_v38  ;;  %v4067_v38 = vld [vmem:[#allocation10 + $0x34] sm:$0xf]  ;;  %v3160_v11 = vor.u32 %v4084_v9, %v3159_v8  ;;  %v3143_v35 = vld [vmem:[#allocation10 + $0x90] sm:$0xf]  ;;  %v4122_v8 = vld [vmem:[#allocation7 + $0xe4] sm:$0xf0] }
  0x7a   :  { %844 = vmatpush.bf16.msra.mxu0 %v2944_v29  ;;  %v3177_v29 = vld [vmem:[#allocation10 + $0xd8] sm:$0xf0]  ;;  %v3100_v45 = vor.u32 %v4067_v38, %v3097_v40  ;;  %v4079_v38 = vld [vmem:[#allocation10 + $0x94] sm:$0xf] }
  0x7b   :  { %857 = vmatpush.bf16.msra.mxu1 %v3008_v44 }
  0x7c   :  { %870 = vmatpush.bf16.msra.mxu2 %v2948_v31  ;;  %v3180_v31 = vor.u32 %v4087_v26, %v3177_v29  ;;  %v4081_v26 = vld [vmem:[#allocation10 + $0xa4] sm:$0xf]  ;;  %v3071_v29 = vld [vmem:[#allocation10] sm:$0xf] }
  0x7d   :  { %883 = vmatpush.bf16.msra.mxu3 %v3012_v47  ;;  %v3156_v28 = vor.u32 %v4081_v26, %v3153_v27 }
  0x7e   :  { %1085 = vmatpush.bf16.msrb.mxu0 %v3128_v53 }
  0x7f   :  { %1098 = vmatpush.bf16.msrb.mxu1 %v3192_v5  ;;  %v4065_v5 = vld [vmem:[#allocation10 + $0x24] sm:$0xf] }
  0x80   :  { %1111 = vmatpush.bf16.msrb.mxu2 %v3132_v58  ;;  %v3092_v10 = vor.u32 %v4065_v5, %v3089_v7  ;;  %v4103_v5 = vld [vmem:[#allocation7 + $0x54] sm:$0xf]  ;;  %v3311_v7 = vld [vmem:[#allocation7 + $0xe0] sm:$0xf] }
  0x81   :  { %1124 = vmatpush.bf16.msrb.mxu3 %v3196_v6  ;;  %v3312_v9 = vor.u32 %v4122_v8, %v3311_v7  ;;  %v3289_v8 = vld [vmem:[#allocation7 + $0xb8] sm:$0xf0] }
  0x82   :  { %1086 = vmatpush.bf16.msrb.mxu0 %v3120_v62  ;;  %v4085_v62 = vld [vmem:[#allocation10 + $0xc4] sm:$0xf] }
  0x83   :  { %1099 = vmatpush.bf16.msrb.mxu1 %v3184_v13  ;;  %v3172_v2 = vor.u32 %v4085_v62, %v3169_v1  ;;  %v3161_v13 = vld [vmem:[#allocation10 + $0xb8] sm:$0xf0] }
  0x84   :  { %1112 = vmatpush.bf16.msrb.mxu2 %v3124_v3  ;;  %v4066_v3 = vld [vmem:[#allocation10 + $0x24] sm:$0xf0]  ;;  %v3164_v14 = vor.u32 %v4083_v12, %v3161_v13  ;;  %v3321_v62 = vld [vmem:[#allocation7 + $0xf8] sm:$0xf0] }
  0x85   :  { %1125 = vmatpush.bf16.msrb.mxu3 %v3188_v18 }
  0x86   :  { %1087 = vmatpush.bf16.msrb.mxu0 %v3112_v17  ;;  %v4063_v17 = vld [vmem:[#allocation10 + $0x14] sm:$0xf] }
  0x87   :  { %1100 = vmatpush.bf16.msrb.mxu1 %v3176_v30  ;;  %v3084_v20 = vor.u32 %v4063_v17, %v3081_v19  ;;  %v4062_v30 = vld [vmem:[#allocation10 + $0x4] sm:$0xf0]  ;;  %v3303_v17 = vld [vmem:[#allocation7 + $0xd0] sm:$0xf]  ;;  %v4119_v19 = vld [vmem:[#allocation7 + $0xd4] sm:$0xf] }
  0x88   :  { %1113 = vmatpush.bf16.msrb.mxu2 %v3116_v22  ;;  %v3151_v22 = vld [vmem:[#allocation10 + $0xa0] sm:$0xf] }
  0x89   :  { %1126 = vmatpush.bf16.msrb.mxu3 %v3180_v31  ;;  %v3152_v25 = vor.u32 %v4082_v23, %v3151_v22  ;;  %v4061_v31 = vld [vmem:[#allocation10 + $0x4] sm:$0xf]  ;;  %v3233_v22 = vld [vmem:[#allocation7 + $0x48] sm:$0xf0]  ;;  %v3305_v23 = vld [vmem:[#allocation7 + $0xd8] sm:$0xf0] }
  0x8a   :  { %1088 = vmatpush.bf16.msrb.mxu0 %v3104_v32  ;;  %v3072_v32 = vor.u32 %v4062_v30, %v3071_v29  ;;  %v3308_v27 = vor.u32 %v4119_v19, %v3305_v23  ;;  %v3199_v23 = vld [vmem:[#allocation7] sm:$0xf] }
  0x8c   :  { %1114 = vmatpush.bf16.msrb.mxu2 %v3108_v33  ;;  %v3073_v33 = vld [vmem:[#allocation10 + $0x8] sm:$0xf0] }
  0x8d   :  { %1127 = vmatpush.bf16.msrb.mxu3 %v3172_v2  ;;  %v3076_v34 = vor.u32 %v4061_v31, %v3073_v33 }
  0x8e   :  { %1089 = vmatpush.bf16.msrb.mxu0 %v3096_v42 }
  0x90   :  { %1115 = vmatpush.bf16.msrb.mxu2 %v3100_v45  ;;  %v4077_v45 = vld [vmem:[#allocation10 + $0x84] sm:$0xf] }
  0x91   :  { %1128 = vmatpush.bf16.msrb.mxu3 %v3164_v14  ;;  %v3231_v14 = vld [vmem:[#allocation7 + $0x40] sm:$0xf] }
  0x94   :  { %1116 = vmatpush.bf16.msrb.mxu2 %v3092_v10  ;;  %v4121_v10 = vld [vmem:[#allocation7 + $0xe4] sm:$0xf] }
  0x95   :  { %1129 = vmatpush.bf16.msrb.mxu3 %v3156_v28 }
  0x98   :  { %1117 = vmatpush.bf16.msrb.mxu2 %v3084_v20  ;;  %v4101_v20 = vld [vmem:[#allocation7 + $0x44] sm:$0xf] }
  0x99   :  { %v3236_v30 = vor.u32 %v4101_v20, %v3233_v22  ;;  %v3281_v20 = vld [vmem:[#allocation7 + $0xa8] sm:$0xf0] }
  0x9c   :  { %1118 = vmatpush.bf16.msrb.mxu2 %v3076_v34 }
  0xba   :  { %v4573_v21 = vpop.f32.mrf.mxu0 }
  0xbb   :  { %v4575_v24 = vpop.f32.mrf.mxu1  ;;  %v338_v36 = vadd.f32 %v4573_v21, %v158_v16  ;;  %v4064_v16 = vld [vmem:[#allocation10 + $0x14] sm:$0xf0] }
  0xbc   :  { %v3080_v18 = vor.u32 %v4064_v16, %v3079_v15  ;;  %v4102_v15 = vld [vmem:[#allocation7 + $0x44] sm:$0xf0] }
  0xbd   :  { %v3232_v29 = vor.u32 %v4102_v15, %v3231_v14  ;;  %v3209_v14 = vld [vmem:[#allocation7 + $0x18] sm:$0xf0] }
  0xc2   :  { %v4577_v37 = vpop.f32.mrf.mxu2  ;;  %v339_v43 = vpop.f32.mrf.mxu0 }
  0xc3   :  { %v4579_v39 = vpop.f32.mrf.mxu3  ;;  %v352_v46 = vpop.f32.mrf.mxu1  ;;  %v159_v43 = vperm.slane %v4584_v57, 1 }
  0xc4   :  { %v4590_v46 = vadd.f32 %v4575_v24, %v338_v36  ;;  %v4080_v36 = vld [vmem:[#allocation10 + $0x94] sm:$0xf0] }
  0xc5   :  { %v364_v21 = vadd.f32 %v4577_v37, %v159_v43  ;;  %v3167_v37 = vld [vmem:[#allocation10 + $0xc0] sm:$0xf]  ;;  %v3144_v40 = vor.u32 %v4080_v36, %v3143_v35 }
  0xc6   :  { %v3168_v63 = vor.u32 %v4086_v61, %v3167_v37  ;;  %v3135_v43 = vld [vmem:[#allocation10 + $0x80] sm:$0xf]  ;;  %v4124_v37 = vld [vmem:[#allocation7 + $0xf4] sm:$0xf0]  ;;  %v4123_v61 = vld [vmem:[#allocation7 + $0xf4] sm:$0xf] }
  0xc7   :  { %v4595_v54 = vadd.f32 %v4579_v39, %v364_v21  ;;  %v3087_v39 = vld [vmem:[#allocation10 + $0x20] sm:$0xf]  ;;  %v3324_v2 = vor.u32 %v4123_v61, %v3321_v62  ;;  %v4098_v61 = vld [vmem:[#allocation7 + $0x24] sm:$0xf0] }
  0xc8   :  { %1101 = vmatpush.bf16.msrb.mxu1 %v3168_v63  ;;  %v3088_v6 = vor.u32 %v4066_v3, %v3087_v39  ;;  %v3239_v39 = vld [vmem:[#allocation7 + $0x50] sm:$0xf]  ;;  %v4104_v3 = vld [vmem:[#allocation7 + $0x54] sm:$0xf0] }
  0xc9   :  { %v3240_v12 = vor.u32 %v4104_v3, %v3239_v39  ;;  %v3287_v3 = vld [vmem:[#allocation7 + $0xb0] sm:$0xf] }
  0xca   :  { %v365_v48 = vpop.f32.mrf.mxu2  ;;  %1090 = vmatpush.bf16.msrb.mxu0 %v3088_v6  ;;  %v3241_v6 = vld [vmem:[#allocation7 + $0x58] sm:$0xf0] }
  0xcb   :  { %v378_v52 = vpop.f32.mrf.mxu3  ;;  %v3244_v16 = vor.u32 %v4103_v5, %v3241_v6  ;;  %v4116_v5 = vld [vmem:[#allocation7 + $0xb4] sm:$0xf0]  ;;  %v4115_v6 = vld [vmem:[#allocation7 + $0xb4] sm:$0xf] }
  0xcc   :  { %1102 = vmatpush.bf16.msrb.mxu1 %v3160_v11  ;;  %v3313_v11 = vld [vmem:[#allocation7 + $0xe8] sm:$0xf0]  ;;  %v3288_v7 = vor.u32 %v4116_v5, %v3287_v3  ;;  %v3439_v3 = vld [vmem:[#allocation8 + $0xe0] sm:$0xf]  ;;  %v4154_v5 = vld [vmem:[#allocation8 + $0xe4] sm:$0xf0] }
  0xcd   :  { %v3316_v13 = vor.u32 %v4121_v10, %v3313_v11  ;;  %v3207_v10 = vld [vmem:[#allocation7 + $0x10] sm:$0xf]  ;;  %v4096_v11 = vld [vmem:[#allocation7 + $0x14] sm:$0xf0] }
  0xce   :  { %1091 = vmatpush.bf16.msrb.mxu0 %v3080_v18  ;;  %v4120_v18 = vld [vmem:[#allocation7 + $0xd4] sm:$0xf0] }
  0xcf   :  { %v3304_v26 = vor.u32 %v4120_v18, %v3303_v17  ;;  %v4114_v17 = vld [vmem:[#allocation7 + $0xa4] sm:$0xf0]  ;;  %v4113_v18 = vld [vmem:[#allocation7 + $0xa4] sm:$0xf] }
  0xd0   :  { %1103 = vmatpush.bf16.msrb.mxu1 %v3152_v25  ;;  %v380_v25 = vld [vmem:[%s4665_s5] sm:$0x3]  ;;  %v3284_v22 = vor.u32 %v4113_v18, %v3281_v20  ;;  %v3361_v18 = vld [vmem:[#allocation8 + $0x48] sm:$0xf0] }
  0xd1   :  { %v4601_v31 = vperm.slane %v380_v25, 0  ;;  %v4604_v36 = vperm.slane %v380_v25, 1  ;;  %v4094_v25 = vld [vmem:[#allocation7 + $0x4] sm:$0xf0] }
  0xd2   :  { %1092 = vmatpush.bf16.msrb.mxu0 %v3072_v32 }
  0xd4   :  { %1104 = vmatpush.bf16.msrb.mxu1 %v3144_v40 }
  0xda   :  { %v591_v41 = vpop.f32.mrf.mxu0 }
  0xdb   :  { %v604_v44 = vpop.f32.mrf.mxu1 }
  0xdc   :  { %v605_v47 = vadd.f32 %v604_v44, %v591_v41  ;;  %v3145_v41 = vld [vmem:[#allocation10 + $0x98] sm:$0xf0]  ;;  %v4078_v44 = vld [vmem:[#allocation10 + $0x84] sm:$0xf0] }
  0xdd   :  { %v3148_v42 = vor.u32 %v4079_v38, %v3145_v41 }
  0xde   :  { %v634_v48 = vadd.f32 %v605_v47, %v4590_v46  ;;  %v3136_v47 = vor.u32 %v4078_v44, %v3135_v43 }
  0xdf   :  { %1130 = vmatpush.bf16.msrb.mxu3 %v3148_v42 }
  0xe0   :  { %v636_v49 = vmax.f32 %v634_v48, 0.0  ;;  %v3137_v48 = vld [vmem:[#allocation10 + $0x88] sm:$0xf0]  ;;  %1105 = vmatpush.bf16.msrb.mxu1 %v3136_v47 }
  0xe1   :  { %v3140_v21 = vor.u32 %v4077_v45, %v3137_v48 }
  0xe2   :  { %v617_v50 = vpop.f32.mrf.mxu2  ;;  %v638_v51 = vpack.c.bf16 %v636_v49, %v636_v49  ;;  %v593_v53 = vpop.f32.mrf.mxu0  ;;  %v3255_v49 = vld [vmem:[#allocation7 + $0x70] sm:$0xf] }
  0xe3   :  { %v630_v52 = vpop.f32.mrf.mxu3  ;;  %v606_v56 = vpop.f32.mrf.mxu1  ;;  %1131 = vmatpush.bf16.msrb.mxu3 %v3140_v21  ;;  %v3257_v53 = vld [vmem:[#allocation7 + $0x78] sm:$0xf0] }
  0xe4   :  { %v631_v55 = vadd.f32 %v630_v52, %v617_v50  ;;  %845 = vmatmul.bf16.vlgmr.msra.gmra.mxu0 %v638_v51  ;;  %871 = vmatmul.bf16.vlgmr.msra.gmra.mxu2 %v638_v51  ;;  %v4108_v50 = vld [vmem:[#allocation7 + $0x74] sm:$0xf0]  ;;  %v4107_v51 = vld [vmem:[#allocation7 + $0x74] sm:$0xf]  ;;  %v4106_v56 = vld [vmem:[#allocation7 + $0x64] sm:$0xf0] }
  0xe5   :  { %v3256_v52 = vor.u32 %v4108_v50, %v3255_v49  ;;  %v3223_v50 = vld [vmem:[#allocation7 + $0x30] sm:$0xf] }
  0xe6   :  { %v635_v24 = vadd.f32 %v631_v55, %v4595_v54  ;;  %v3247_v55 = vld [vmem:[#allocation7 + $0x60] sm:$0xf] }
  0xe7   :  { %1347 = vmatpush.bf16.msra.mxu0 %v3256_v52  ;;  %v4099_v52 = vld [vmem:[#allocation7 + $0x34] sm:$0xf] }
  0xe8   :  { %v637_v57 = vmax.f32 %v635_v24, 0.0  ;;  %v3260_v24 = vor.u32 %v4107_v51, %v3257_v53  ;;  %v4100_v51 = vld [vmem:[#allocation7 + $0x34] sm:$0xf0] }
  0xe9   :  { %v3224_v53 = vor.u32 %v4100_v51, %v3223_v50  ;;  %v3385_v50 = vld [vmem:[#allocation8 + $0x78] sm:$0xf0]  ;;  %v3375_v51 = vld [vmem:[#allocation8 + $0x60] sm:$0xf] }
  0xea   :  { %v639_v58 = vpack.c.bf16 %v637_v57, %v637_v57  ;;  %v619_v59 = vpop.f32.mrf.mxu2  ;;  %v4105_v57 = vld [vmem:[#allocation7 + $0x64] sm:$0xf]  ;;  %1373 = vmatpush.bf16.msra.mxu2 %v3260_v24  ;;  %v3295_v24 = vld [vmem:[#allocation7 + $0xc0] sm:$0xf] }
  0xeb   :  { %v632_v60 = vpop.f32.mrf.mxu3  ;;  %v3319_v59 = vld [vmem:[#allocation7 + $0xf0] sm:$0xf] }
  0xec   :  { %858 = vmatmul.bf16.vlgmr.msra.gmra.mxu1 %v639_v58  ;;  %884 = vmatmul.bf16.vlgmr.msra.gmra.mxu3 %v639_v58  ;;  %v3249_v58 = vld [vmem:[#allocation7 + $0x68] sm:$0xf0]  ;;  %v3248_v60 = vor.u32 %v4106_v56, %v3247_v55  ;;  %v3320_v1 = vor.u32 %v4124_v37, %v3319_v59  ;;  %v3225_v55 = vld [vmem:[#allocation7 + $0x38] sm:$0xf0]  ;;  %v3215_v37 = vld [vmem:[#allocation7 + $0x20] sm:$0xf] }
  0xed   :  { %v3252_v63 = vor.u32 %v4105_v57, %v3249_v58  ;;  %1386 = vmatpush.bf16.msra.mxu3 %v3324_v2  ;;  %v3228_v56 = vor.u32 %v4099_v52, %v3225_v55  ;;  %v4118_v57 = vld [vmem:[#allocation7 + $0xc4] sm:$0xf0]  ;;  %v4117_v58 = vld [vmem:[#allocation7 + $0xc4] sm:$0xf]  ;;  %v3217_v2 = vld [vmem:[#allocation7 + $0x28] sm:$0xf0] }
  0xee   :  { %1360 = vmatpush.bf16.msra.mxu1 %v3320_v1  ;;  %1348 = vmatpush.bf16.msra.mxu0 %v3248_v60  ;;  %v3296_v59 = vor.u32 %v4118_v57, %v3295_v24  ;;  %v3297_v60 = vld [vmem:[#allocation7 + $0xc8] sm:$0xf0]  ;;  %v4097_v1 = vld [vmem:[#allocation7 + $0x24] sm:$0xf]  ;;  %v4138_v52 = vld [vmem:[#allocation8 + $0x64] sm:$0xf0] }
  0xef   :  { %1374 = vmatpush.bf16.msra.mxu2 %v3252_v63  ;;  %v3300_v62 = vor.u32 %v4117_v58, %v3297_v60  ;;  %v3216_v63 = vor.u32 %v4098_v61, %v3215_v37  ;;  %v3220_v39 = vor.u32 %v4097_v1, %v3217_v2  ;;  %v4137_v55 = vld [vmem:[#allocation8 + $0x64] sm:$0xf]  ;;  %v3447_v24 = vld [vmem:[#allocation8 + $0xf0] sm:$0xf]  ;;  %v3376_v57 = vor.u32 %v4138_v52, %v3375_v51  ;;  %v4156_v58 = vld [vmem:[#allocation8 + $0xf4] sm:$0xf0] }
  0xf0   :  { %v3449_v60 = vld [vmem:[#allocation8 + $0xf8] sm:$0xf0]  ;;  %v3448_v61 = vor.u32 %v4156_v58, %v3447_v24  ;;  %v4136_v1 = vld [vmem:[#allocation8 + $0x54] sm:$0xf0]  ;;  %v4135_v2 = vld [vmem:[#allocation8 + $0x54] sm:$0xf] }
  0xf1   :  { %1387 = vmatpush.bf16.msra.mxu3 %v3316_v13  ;;  %v3208_v13 = vor.u32 %v4096_v11, %v3207_v10  ;;  %v3359_v11 = vld [vmem:[#allocation8 + $0x40] sm:$0xf]  ;;  %v4131_v51 = vld [vmem:[#allocation8 + $0x34] sm:$0xf]  ;;  %v4150_v24 = vld [vmem:[#allocation8 + $0xc4] sm:$0xf0] }
  0xf2   :  { %1361 = vmatpush.bf16.msra.mxu1 %v3312_v9  ;;  %1349 = vmatpush.bf16.msra.mxu0 %v3240_v12  ;;  %v3292_v9 = vor.u32 %v4115_v6, %v3289_v8  ;;  %v4095_v12 = vld [vmem:[#allocation7 + $0x14] sm:$0xf]  ;;  %v3440_v6 = vor.u32 %v4154_v5, %v3439_v3  ;;  %v3441_v8 = vld [vmem:[#allocation8 + $0xe8] sm:$0xf0]  ;;  %v4148_v3 = vld [vmem:[#allocation8 + $0xb4] sm:$0xf0] }
  0xf3   :  { %1375 = vmatpush.bf16.msra.mxu2 %v3244_v16  ;;  %v3212_v15 = vor.u32 %v4095_v12, %v3209_v14  ;;  %v3279_v16 = vld [vmem:[#allocation7 + $0xa0] sm:$0xf]  ;;  %v4134_v12 = vld [vmem:[#allocation8 + $0x44] sm:$0xf0]  ;;  %v3431_v14 = vld [vmem:[#allocation8 + $0xd0] sm:$0xf] }
  0xf4   :  { %v3280_v19 = vor.u32 %v4114_v17, %v3279_v16  ;;  %v4151_v16 = vld [vmem:[#allocation8 + $0xd4] sm:$0xf]  ;;  %v4133_v17 = vld [vmem:[#allocation8 + $0x44] sm:$0xf] }
  0xf5   :  { %1388 = vmatpush.bf16.msra.mxu3 %v3308_v27  ;;  %v4093_v27 = vld [vmem:[#allocation7 + $0x4] sm:$0xf]  ;;  %v4147_v5 = vld [vmem:[#allocation8 + $0xb4] sm:$0xf] }
  0xf6   :  { %1362 = vmatpush.bf16.msra.mxu1 %v3304_v26  ;;  %1350 = vmatpush.bf16.msra.mxu0 %v3232_v29  ;;  %v3200_v26 = vor.u32 %v4094_v25, %v3199_v23  ;;  %v3360_v25 = vor.u32 %v4134_v12, %v3359_v11  ;;  %v4127_v11 = vld [vmem:[#allocation8 + $0x14] sm:$0xf] }
  0xf7   :  { %1376 = vmatpush.bf16.msra.mxu2 %v3236_v30  ;;  %v3271_v30 = vld [vmem:[#allocation7 + $0x90] sm:$0xf] }
  0xf9   :  { %1389 = vmatpush.bf16.msra.mxu3 %v3300_v62 }
  0xfa   :  { %1351 = vmatpush.bf16.msra.mxu0 %v3224_v53  ;;  %1363 = vmatpush.bf16.msra.mxu1 %v3296_v59  ;;  %v4155_v59 = vld [vmem:[#allocation8 + $0xf4] sm:$0xf] }
  0xfb   :  { %1377 = vmatpush.bf16.msra.mxu2 %v3228_v56  ;;  %v3377_v56 = vld [vmem:[#allocation8 + $0x68] sm:$0xf0]  ;;  %v3452_v62 = vor.u32 %v4155_v59, %v3449_v60  ;;  %v3343_v60 = vld [vmem:[#allocation8 + $0x20] sm:$0xf] }
  0xfc   :  { %v3380_v37 = vor.u32 %v4137_v55, %v3377_v56  ;;  %v3423_v56 = vld [vmem:[#allocation8 + $0xc0] sm:$0xf]  ;;  %v3425_v59 = vld [vmem:[#allocation8 + $0xc8] sm:$0xf0] }
  0xfd   :  { %1390 = vmatpush.bf16.msra.mxu3 %v3292_v9  ;;  %v3424_v58 = vor.u32 %v4150_v24, %v3423_v56  ;;  %v4169_v56 = vld [vmem:[#allocation10 + $0x64] sm:$0xf]  ;;  %v3505_v24 = vld [vmem:[#allocation10 + $0x68] sm:$0xf0] }
  0xfe   :  { %1352 = vmatpush.bf16.msra.mxu0 %v3216_v63  ;;  %1364 = vmatpush.bf16.msra.mxu1 %v3288_v7  ;;  %v3367_v63 = vld [vmem:[#allocation8 + $0x50] sm:$0xf]  ;;  %v4153_v7 = vld [vmem:[#allocation8 + $0xe4] sm:$0xf] }
  0xff   :  { %1378 = vmatpush.bf16.msra.mxu2 %v3220_v39  ;;  %v3369_v39 = vld [vmem:[#allocation8 + $0x58] sm:$0xf0]  ;;  %v3368_v9 = vor.u32 %v4136_v1, %v3367_v63  ;;  %v3444_v10 = vor.u32 %v4153_v7, %v3441_v8  ;;  %v4129_v63 = vld [vmem:[#allocation8 + $0x24] sm:$0xf]  ;;  %v3345_v1 = vld [vmem:[#allocation8 + $0x28] sm:$0xf0] }
 0x100   :  { %v3417_v7 = vld [vmem:[#allocation8 + $0xb8] sm:$0xf0] }
 0x101   :  { %1391 = vmatpush.bf16.msra.mxu3 %v3284_v22  ;;  %v3420_v8 = vor.u32 %v4147_v5, %v3417_v7  ;;  %v3567_v5 = vld [vmem:[#allocation10 + $0xe0] sm:$0xf] }
 0x102   :  { %1353 = vmatpush.bf16.msra.mxu0 %v3208_v13  ;;  %1365 = vmatpush.bf16.msra.mxu1 %v3280_v19  ;;  %v3372_v13 = vor.u32 %v4135_v2, %v3369_v39  ;;  %v3433_v19 = vld [vmem:[#allocation8 + $0xd8] sm:$0xf0]  ;;  %v3348_v2 = vor.u32 %v4129_v63, %v3345_v1  ;;  %v3415_v39 = vld [vmem:[#allocation8 + $0xb0] sm:$0xf] }
 0x103   :  { %1379 = vmatpush.bf16.msra.mxu2 %v3212_v15  ;;  %v4152_v15 = vld [vmem:[#allocation8 + $0xd4] sm:$0xf0]  ;;  %v3436_v22 = vor.u32 %v4151_v16, %v3433_v19  ;;  %v4146_v16 = vld [vmem:[#allocation8 + $0xa4] sm:$0xf0]  ;;  %v3409_v19 = vld [vmem:[#allocation8 + $0xa8] sm:$0xf0] }
 0x104   :  { %v3432_v20 = vor.u32 %v4152_v15, %v3431_v14  ;;  %v3407_v15 = vld [vmem:[#allocation8 + $0xa0] sm:$0xf]  ;;  %v3495_v1 = vld [vmem:[#allocation10 + $0x50] sm:$0xf] }
 0x106   :  { %1354 = vmatpush.bf16.msra.mxu0 %v3200_v26  ;;  %v3364_v26 = vor.u32 %v4133_v17, %v3361_v18  ;;  %v4145_v17 = vld [vmem:[#allocation8 + $0xa4] sm:$0xf]  ;;  %v3408_v18 = vor.u32 %v4146_v16, %v3407_v15  ;;  %v3559_v15 = vld [vmem:[#allocation10 + $0xd0] sm:$0xf]  ;;  %v4184_v16 = vld [vmem:[#allocation10 + $0xd4] sm:$0xf0] }
 0x161   :  { %v846_v28 = vpop.f32.mrf.mxu0 }
 0x162   :  { %v847_v32 = vadd.f32 %v846_v28, %v4601_v31  ;;  %v3201_v28 = vld [vmem:[#allocation7 + $0x8] sm:$0xf0] }
 0x163   :  { %v3204_v29 = vor.u32 %v4093_v27, %v3201_v28  ;;  %v381_v27 = vld [vmem:[%s4667_s7] sm:$0x3]  ;;  %s4482_s7 = smov [#allocation13]  }
 0x164   :  { %s2667_s18 = sshll.u32 %s4482_s7, 4  ;;  %s2668_s18 = int_to_ptr.vmem [resolvable:$true] %s2667_s18 }
 0x165   :  { %1380 = vmatpush.bf16.msra.mxu2 %v3204_v29 }
 0x167   :  { %v872_v33 = vpop.f32.mrf.mxu2 }
 0x168   :  { %v873_v42 = vadd.f32 %v872_v33, %v4604_v36  ;;  %v4111_v33 = vld [vmem:[#allocation7 + $0x94] sm:$0xf] }
 0x169   :  { %v859_v34 = vpop.f32.mrf.mxu1  ;;  %v848_v38 = vpop.f32.mrf.mxu0 }
 0x16a   :  { %v860_v35 = vadd.f32 %v859_v34, %v847_v32  ;;  %v4112_v32 = vld [vmem:[#allocation7 + $0x94] sm:$0xf0] }
 0x16b   :  { %v3272_v34 = vor.u32 %v4112_v32, %v3271_v30  ;;  %v4610_v32 = vperm.slane %v381_v27, 0 }
 0x16c   :  { %v889_v40 = vmax.f32 %v860_v35, 0.0  ;;  %v3273_v35 = vld [vmem:[#allocation7 + $0x98] sm:$0xf0] }
 0x16d   :  { %v3276_v38 = vor.u32 %v4111_v33, %v3273_v35  ;;  %1366 = vmatpush.bf16.msra.mxu1 %v3272_v34 }
 0x16e   :  { %v891_v41 = vpack.c.bf16 %v889_v40, %v889_v40  ;;  %v3263_v40 = vld [vmem:[#allocation7 + $0x80] sm:$0xf] }
 0x16f   :  { %v885_v43 = vpop.f32.mrf.mxu3  ;;  %v874_v45 = vpop.f32.mrf.mxu2  ;;  %1392 = vmatpush.bf16.msra.mxu3 %v3276_v38 }
 0x170   :  { %v886_v44 = vadd.f32 %v885_v43, %v873_v42  ;;  %1093 = vmatmul.bf16.vlgmr.msrb.gmra.mxu0 %v891_v41  ;;  %1119 = vmatmul.bf16.vlgmr.msrb.gmra.mxu2 %v891_v41  ;;  %v4110_v41 = vld [vmem:[#allocation7 + $0x84] sm:$0xf0]  ;;  %v4109_v43 = vld [vmem:[#allocation7 + $0x84] sm:$0xf] }
 0x171   :  { %v861_v47 = vpop.f32.mrf.mxu1  ;;  %v3264_v42 = vor.u32 %v4110_v41, %v3263_v40  ;;  %v4616_v41 = vperm.slane %v381_v27, 1  ;;  %v3329_v27 = vld [vmem:[#allocation8 + $0x8] sm:$0xf0] }
 0x172   :  { %v890_v48 = vmax.f32 %v886_v44, 0.0  ;;  %v3265_v44 = vld [vmem:[#allocation7 + $0x88] sm:$0xf0]  ;;  %v3383_v47 = vld [vmem:[#allocation8 + $0x70] sm:$0xf] }
 0x173   :  { %v3268_v45 = vor.u32 %v4109_v43, %v3265_v44  ;;  %1367 = vmatpush.bf16.msra.mxu1 %v3264_v42 }
 0x174   :  { %v892_v21 = vpack.c.bf16 %v890_v48, %v890_v48  ;;  %v4140_v48 = vld [vmem:[#allocation8 + $0x74] sm:$0xf0] }
 0x175   :  { %1393 = vmatpush.bf16.msra.mxu3 %v3268_v45 }
 0x176   :  { %1106 = vmatmul.bf16.vlgmr.msrb.gmra.mxu1 %v892_v21  ;;  %1132 = vmatmul.bf16.vlgmr.msrb.gmra.mxu3 %v892_v21  ;;  %v4139_v21 = vld [vmem:[#allocation8 + $0x74] sm:$0xf] }
 0x177   :  { %v887_v49 = vpop.f32.mrf.mxu3  ;;  %v3388_v53 = vor.u32 %v4139_v21, %v3385_v50  ;;  %1610 = vmatpush.bf16.msrb.mxu1 %v3448_v61  ;;  %v3351_v50 = vld [vmem:[#allocation8 + $0x30] sm:$0xf] }
 0x178   :  { %v3384_v49 = vor.u32 %v4140_v48, %v3383_v47 }
 0x179   :  { %1623 = vmatpush.bf16.msrb.mxu2 %v3388_v53  ;;  %1636 = vmatpush.bf16.msrb.mxu3 %v3452_v62  ;;  %v3353_v53 = vld [vmem:[#allocation8 + $0x38] sm:$0xf0] }
 0x17a   :  { %1597 = vmatpush.bf16.msrb.mxu0 %v3384_v49  ;;  %v3356_v55 = vor.u32 %v4131_v51, %v3353_v53  ;;  %v3513_v51 = vld [vmem:[#allocation10 + $0x78] sm:$0xf0]  ;;  %v4170_v53 = vld [vmem:[#allocation10 + $0x64] sm:$0xf0] }
 0x17b   :  { %1611 = vmatpush.bf16.msrb.mxu1 %v3440_v6  ;;  %v3416_v6 = vor.u32 %v4148_v3, %v3415_v39  ;;  %v4167_v39 = vld [vmem:[#allocation10 + $0x54] sm:$0xf]  ;;  %v3497_v3 = vld [vmem:[#allocation10 + $0x58] sm:$0xf0] }
 0x17d   :  { %1624 = vmatpush.bf16.msrb.mxu2 %v3380_v37  ;;  %1637 = vmatpush.bf16.msrb.mxu3 %v3444_v10  ;;  %v4130_v37 = vld [vmem:[#allocation8 + $0x24] sm:$0xf0]  ;;  %v4128_v10 = vld [vmem:[#allocation8 + $0x14] sm:$0xf0] }
 0x17e   :  { %1598 = vmatpush.bf16.msrb.mxu0 %v3376_v57  ;;  %v4149_v57 = vld [vmem:[#allocation8 + $0xc4] sm:$0xf]  ;;  %v3344_v62 = vor.u32 %v4130_v37, %v3343_v60  ;;  %v4187_v60 = vld [vmem:[#allocation10 + $0xf4] sm:$0xf]  ;;  %v3577_v37 = vld [vmem:[#allocation10 + $0xf8] sm:$0xf0] }
 0x17f   :  { %1612 = vmatpush.bf16.msrb.mxu1 %v3432_v20  ;;  %v3428_v61 = vor.u32 %v4149_v57, %v3425_v59  ;;  %v3412_v20 = vor.u32 %v4145_v17, %v3409_v19  ;;  %v3575_v57 = vld [vmem:[#allocation10 + $0xf0] sm:$0xf]  ;;  %v4188_v59 = vld [vmem:[#allocation10 + $0xf4] sm:$0xf0]  ;;  %v3580_v63 = vor.u32 %v4187_v60, %v3577_v37  ;;  %v4183_v17 = vld [vmem:[#allocation10 + $0xd4] sm:$0xf] }
 0x180   :  { %v3489_v19 = vld [vmem:[#allocation10 + $0x48] sm:$0xf0]  ;;  %v3471_v37 = vld [vmem:[#allocation10 + $0x20] sm:$0xf] }
 0x181   :  { %1625 = vmatpush.bf16.msrb.mxu2 %v3372_v13  ;;  %1638 = vmatpush.bf16.msrb.mxu3 %v3436_v22  ;;  %v3337_v13 = vld [vmem:[#allocation8 + $0x18] sm:$0xf0]  ;;  %v3327_v22 = vld [vmem:[#allocation8] sm:$0xf] }
 0x182   :  { %1599 = vmatpush.bf16.msrb.mxu0 %v3368_v9  ;;  %v3335_v9 = vld [vmem:[#allocation8 + $0x10] sm:$0xf]  ;;  %v3340_v14 = vor.u32 %v4127_v11, %v3337_v13  ;;  %v4166_v13 = vld [vmem:[#allocation10 + $0x44] sm:$0xf0] }
 0x183   :  { %1613 = vmatpush.bf16.msrb.mxu1 %v3424_v58  ;;  %v3336_v12 = vor.u32 %v4128_v10, %v3335_v9  ;;  %v3569_v9 = vld [vmem:[#allocation10 + $0xe8] sm:$0xf0] }
 0x185   :  { %1626 = vmatpush.bf16.msrb.mxu2 %v3364_v26  ;;  %1639 = vmatpush.bf16.msrb.mxu3 %v3428_v61  ;;  %v3508_v61 = vor.u32 %v4169_v56, %v3505_v24  ;;  %v3551_v56 = vld [vmem:[#allocation10 + $0xc0] sm:$0xf]  ;;  %v4182_v24 = vld [vmem:[#allocation10 + $0xc4] sm:$0xf0] }
 0x186   :  { %1600 = vmatpush.bf16.msrb.mxu0 %v3360_v25  ;;  %v4125_v25 = vld [vmem:[#allocation8 + $0x4] sm:$0xf] }
 0x187   :  { %1614 = vmatpush.bf16.msrb.mxu1 %v3416_v6  ;;  %v4186_v6 = vld [vmem:[#allocation10 + $0xe4] sm:$0xf0] }
 0x188   :  { %v3568_v7 = vor.u32 %v4186_v6, %v3567_v5  ;;  %v4179_v5 = vld [vmem:[#allocation10 + $0xb4] sm:$0xf] }
 0x189   :  { %1627 = vmatpush.bf16.msrb.mxu2 %v3356_v55  ;;  %1640 = vmatpush.bf16.msrb.mxu3 %v3420_v8  ;;  %v4185_v8 = vld [vmem:[#allocation10 + $0xe4] sm:$0xf] }
 0x18a   :  { %v3572_v11 = vor.u32 %v4185_v8, %v3569_v9  ;;  %v3463_v9 = vld [vmem:[#allocation10 + $0x10] sm:$0xf] }
 0x18b   :  { %1615 = vmatpush.bf16.msrb.mxu1 %v3408_v18  ;;  %v4165_v18 = vld [vmem:[#allocation10 + $0x44] sm:$0xf] }
 0x18d   :  { %1628 = vmatpush.bf16.msrb.mxu2 %v3348_v2  ;;  %1641 = vmatpush.bf16.msrb.mxu3 %v3412_v20  ;;  %v4168_v2 = vld [vmem:[#allocation10 + $0x54] sm:$0xf0]  ;;  %v3561_v20 = vld [vmem:[#allocation10 + $0xd8] sm:$0xf0] }
 0x18e   :  { %v3496_v10 = vor.u32 %v4168_v2, %v3495_v1  ;;  %v3473_v1 = vld [vmem:[#allocation10 + $0x28] sm:$0xf0] }
 0x191   :  { %1629 = vmatpush.bf16.msrb.mxu2 %v3340_v14  ;;  %v3500_v14 = vor.u32 %v4167_v39, %v3497_v3  ;;  %v3543_v39 = vld [vmem:[#allocation10 + $0xb0] sm:$0xf]  ;;  %v4180_v3 = vld [vmem:[#allocation10 + $0xb4] sm:$0xf0] }
 0x192   :  { %v3544_v6 = vor.u32 %v4180_v3, %v3543_v39  ;;  %v4199_v39 = vld [vmem:[#allocation7 + $0x54] sm:$0xf]  ;;  %v3625_v3 = vld [vmem:[#allocation7 + $0x58] sm:$0xf0] }
 0x1ed   :  { %v1094_v23 = vpop.f32.mrf.mxu0 }
 0x1f3   :  { %v1107_v28 = vpop.f32.mrf.mxu1  ;;  %v1120_v29 = vpop.f32.mrf.mxu2 }
 0x1f4   :  { %v1108_v30 = vadd.f32 %v1107_v28, %v1094_v23  ;;  %v4126_v23 = vld [vmem:[#allocation8 + $0x4] sm:$0xf0]  ;;  %v3332_v28 = vor.u32 %v4125_v25, %v3329_v27  ;;  %v3492_v27 = vor.u32 %v4165_v18, %v3489_v19  ;;  %v3537_v19 = vld [vmem:[#allocation10 + $0xa8] sm:$0xf0] }
 0x1f5   :  { %v1096_v33 = vpop.f32.mrf.mxu0  ;;  %v3328_v26 = vor.u32 %v4126_v23, %v3327_v22  ;;  %v3560_v22 = vor.u32 %v4184_v16, %v3559_v15  ;;  %v3564_v23 = vor.u32 %v4183_v17, %v3561_v20  ;;  %v3535_v15 = vld [vmem:[#allocation10 + $0xa0] sm:$0xf]  ;;  %v4178_v16 = vld [vmem:[#allocation10 + $0xa4] sm:$0xf0]  ;;  %v4177_v17 = vld [vmem:[#allocation10 + $0xa4] sm:$0xf] }
 0x1f6   :  { %v1137_v34 = vadd.f32 %v1108_v30, %v4565_v0  ;;  %v4144_v30 = vld [vmem:[#allocation8 + $0x94] sm:$0xf0]  ;;  %v4143_v33 = vld [vmem:[#allocation8 + $0x94] sm:$0xf]  ;;  %1630 = vmatpush.bf16.msrb.mxu2 %v3332_v28  ;;  %v3479_v28 = vld [vmem:[#allocation10 + $0x30] sm:$0xf]  ;;  %v3536_v18 = vor.u32 %v4178_v16, %v3535_v15  ;;  %v3540_v20 = vor.u32 %v4177_v17, %v3537_v19 }
 0x1f7   :  { %v3687_v15 = vld [vmem:[#allocation7 + $0xd0] sm:$0xf]  ;;  %v4216_v16 = vld [vmem:[#allocation7 + $0xd4] sm:$0xf0]  ;;  %v4215_v17 = vld [vmem:[#allocation7 + $0xd4] sm:$0xf] }
 0x1f8   :  { %v4614_v35 = vadd.f32 %v4610_v32, %v1137_v34  ;;  %v3617_v19 = vld [vmem:[#allocation7 + $0x48] sm:$0xf0] }
 0x1f9   :  { %v1133_v38 = vpop.f32.mrf.mxu3 }
 0x1fa   :  { %v1134_v40 = vadd.f32 %v1133_v38, %v1120_v29  ;;  %v1153_v42 = vpack.c.bf16 %v4614_v35, %v4614_v35  ;;  %v3399_v29 = vld [vmem:[#allocation8 + $0x90] sm:$0xf]  ;;  %v3401_v38 = vld [vmem:[#allocation8 + $0x98] sm:$0xf0] }
 0x1fb   :  { %v1109_v43 = vpop.f32.mrf.mxu1  ;;  %v1122_v44 = vpop.f32.mrf.mxu2  ;;  %v3400_v34 = vor.u32 %v4144_v30, %v3399_v29  ;;  %v4164_v29 = vld [vmem:[#allocation10 + $0x34] sm:$0xf0]  ;;  %v4163_v30 = vld [vmem:[#allocation10 + $0x34] sm:$0xf] }
 0x1fc   :  { %v1138_v45 = vadd.f32 %v1134_v40, %v4567_v4  ;;  %1355 = vmatmul.bf16.vlgmr.msra.gmra.mxu0 %v1153_v42  ;;  %1381 = vmatmul.bf16.vlgmr.msra.gmra.mxu2 %v1153_v42  ;;  %v4132_v4 = vld [vmem:[#allocation8 + $0x34] sm:$0xf0]  ;;  %v3404_v40 = vor.u32 %v4143_v33, %v3401_v38  ;;  %v3391_v42 = vld [vmem:[#allocation8 + $0x80] sm:$0xf]  ;;  %v4142_v43 = vld [vmem:[#allocation8 + $0x84] sm:$0xf0] }
 0x1fd   :  { %v3352_v52 = vor.u32 %v4132_v4, %v3351_v50  ;;  %1616 = vmatpush.bf16.msrb.mxu1 %v3400_v34  ;;  %v4141_v44 = vld [vmem:[#allocation8 + $0x84] sm:$0xf]  ;;  %v4171_v50 = vld [vmem:[#allocation10 + $0x74] sm:$0xf]  ;;  %v3481_v33 = vld [vmem:[#allocation10 + $0x38] sm:$0xf0]  ;;  %v3480_v34 = vor.u32 %v4164_v29, %v3479_v28 }
 0x1fe   :  { %v4622_v47 = vadd.f32 %v4616_v41, %v1138_v45  ;;  %1642 = vmatpush.bf16.msrb.mxu3 %v3404_v40  ;;  %v3392_v45 = vor.u32 %v4142_v43, %v3391_v42  ;;  %v3516_v55 = vor.u32 %v4171_v50, %v3513_v51  ;;  %v3484_v38 = vor.u32 %v4163_v30, %v3481_v33  ;;  %v3527_v29 = vld [vmem:[#allocation10 + $0x90] sm:$0xf]  ;;  %v4176_v30 = vld [vmem:[#allocation10 + $0x94] sm:$0xf0]  ;;  %v4175_v33 = vld [vmem:[#allocation10 + $0x94] sm:$0xf] }
 0x1ff   :  { %1601 = vmatpush.bf16.msrb.mxu0 %v3352_v52  ;;  %v3503_v52 = vld [vmem:[#allocation10 + $0x60] sm:$0xf] }
 0x200   :  { %v1148_v0 = vrot.slane %v4622_v47, 6  ;;  %v1154_v48 = vpack.c.bf16 %v4622_v47, %v4622_v47  ;;  %v3504_v58 = vor.u32 %v4170_v53, %v3503_v52  ;;  %1871 = vmatpush.bf16.msra.mxu2 %v3516_v55 }
 0x201   :  { %v1135_v21 = vpop.f32.mrf.mxu3  ;;  %1617 = vmatpush.bf16.msrb.mxu1 %v3392_v45 }
 0x202   :  { %1368 = vmatmul.bf16.vlgmr.msra.gmra.mxu1 %v1154_v48  ;;  %1394 = vmatmul.bf16.vlgmr.msra.gmra.mxu3 %v1154_v48  ;;  %v1150_v49 = vsel %vm1149_vm0, %v4614_v35, %v1148_v0  ;;  %v3393_v0 = vld [vmem:[#allocation8 + $0x88] sm:$0xf0]  ;;  %v3511_v21 = vld [vmem:[#allocation10 + $0x70] sm:$0xf] }
 0x203   :  { %1152 = vst [vmem:[#allocation13] sm:$0xf] %v1150_v49  ;;  %1602 = vmatpush.bf16.msrb.mxu0 %v3344_v62  ;;  %v3396_v48 = vor.u32 %v4141_v44, %v3393_v0  ;;  %v4172_v49 = vld [vmem:[#allocation10 + $0x74] sm:$0xf0]  ;;  %v3576_v62 = vor.u32 %v4188_v59, %v3575_v57  ;;  %v4181_v57 = vld [vmem:[#allocation10 + $0xc4] sm:$0xf] }
 0x204   :  { %v3512_v4 = vor.u32 %v4172_v49, %v3511_v21  ;;  %1872 = vmatpush.bf16.msra.mxu2 %v3508_v61  ;;  %v3553_v59 = vld [vmem:[#allocation10 + $0xc8] sm:$0xf0]  ;;  %v4162_v61 = vld [vmem:[#allocation10 + $0x24] sm:$0xf0] }
 0x205   :  { %1643 = vmatpush.bf16.msrb.mxu3 %v3396_v48  ;;  %1858 = vmatpush.bf16.msra.mxu1 %v3576_v62  ;;  %v3556_v60 = vor.u32 %v4181_v57, %v3553_v59  ;;  %v4161_v62 = vld [vmem:[#allocation10 + $0x24] sm:$0xf]  ;;  %v3703_v57 = vld [vmem:[#allocation7 + $0xf0] sm:$0xf]  ;;  %v4220_v59 = vld [vmem:[#allocation7 + $0xf4] sm:$0xf0] }
 0x206   :  { %v3476_v2 = vor.u32 %v4161_v62, %v3473_v1  ;;  %v3704_v62 = vor.u32 %v4220_v59, %v3703_v57  ;;  %v3623_v1 = vld [vmem:[#allocation7 + $0x50] sm:$0xf]  ;;  %v4213_v57 = vld [vmem:[#allocation7 + $0xc4] sm:$0xf]  ;;  %v3681_v59 = vld [vmem:[#allocation7 + $0xc8] sm:$0xf0] }
 0x207   :  { %1603 = vmatpush.bf16.msrb.mxu0 %v3336_v12  ;;  %v3487_v12 = vld [vmem:[#allocation10 + $0x40] sm:$0xf] }
 0x208   :  { %1873 = vmatpush.bf16.msra.mxu2 %v3500_v14 }
 0x209   :  { %1884 = vmatpush.bf16.msra.mxu3 %v3580_v63  ;;  %1859 = vmatpush.bf16.msra.mxu1 %v3568_v7  ;;  %v3472_v63 = vor.u32 %v4162_v61, %v3471_v37  ;;  %v3545_v7 = vld [vmem:[#allocation10 + $0xb8] sm:$0xf0] }
 0x20a   :  { %v3548_v8 = vor.u32 %v4179_v5, %v3545_v7  ;;  %v3705_v37 = vld [vmem:[#allocation7 + $0xf8] sm:$0xf0]  ;;  %v3695_v5 = vld [vmem:[#allocation7 + $0xe0] sm:$0xf] }
 0x20b   :  { %1604 = vmatpush.bf16.msrb.mxu0 %v3328_v26  ;;  %v3488_v26 = vor.u32 %v4166_v13, %v3487_v12  ;;  %v3465_v13 = vld [vmem:[#allocation10 + $0x18] sm:$0xf0] }
 0x20c   :  { %1874 = vmatpush.bf16.msra.mxu2 %v3492_v27  ;;  %v3457_v27 = vld [vmem:[#allocation10 + $0x8] sm:$0xf0] }
 0x20d   :  { %1885 = vmatpush.bf16.msra.mxu3 %v3572_v11  ;;  %1860 = vmatpush.bf16.msra.mxu1 %v3560_v22  ;;  %v4159_v11 = vld [vmem:[#allocation10 + $0x14] sm:$0xf]  ;;  %v3455_v22 = vld [vmem:[#allocation10] sm:$0xf] }
 0x20e   :  { %v3468_v14 = vor.u32 %v4159_v11, %v3465_v13  ;;  %v4198_v13 = vld [vmem:[#allocation7 + $0x44] sm:$0xf0] }
 0x20f   :  { %1845 = vmatpush.bf16.msra.mxu0 %v3512_v4 }
 0x210   :  { %1875 = vmatpush.bf16.msra.mxu2 %v3484_v38  ;;  %v3529_v38 = vld [vmem:[#allocation10 + $0x98] sm:$0xf0] }
 0x211   :  { %1886 = vmatpush.bf16.msra.mxu3 %v3564_v23  ;;  %v4158_v23 = vld [vmem:[#allocation10 + $0x4] sm:$0xf0] }
 0x213   :  { %1846 = vmatpush.bf16.msra.mxu0 %v3504_v58  ;;  %v3552_v58 = vor.u32 %v4182_v24, %v3551_v56  ;;  %v4201_v56 = vld [vmem:[#allocation7 + $0x64] sm:$0xf]  ;;  %v3633_v24 = vld [vmem:[#allocation7 + $0x68] sm:$0xf0] }
 0x214   :  { %1876 = vmatpush.bf16.msra.mxu2 %v3476_v2  ;;  %v3636_v61 = vor.u32 %v4201_v56, %v3633_v24  ;;  %v4200_v2 = vld [vmem:[#allocation7 + $0x54] sm:$0xf0]  ;;  %v3679_v56 = vld [vmem:[#allocation7 + $0xc0] sm:$0xf]  ;;  %v4214_v24 = vld [vmem:[#allocation7 + $0xc4] sm:$0xf0] }
 0x215   :  { %1861 = vmatpush.bf16.msra.mxu1 %v3552_v58  ;;  %1887 = vmatpush.bf16.msra.mxu3 %v3556_v60  ;;  %v4219_v60 = vld [vmem:[#allocation7 + $0xf4] sm:$0xf] }
 0x217   :  { %1847 = vmatpush.bf16.msra.mxu0 %v3496_v10  ;;  %v4160_v10 = vld [vmem:[#allocation10 + $0x14] sm:$0xf0] }
 0x218   :  { %v3464_v12 = vor.u32 %v4160_v10, %v3463_v9  ;;  %1877 = vmatpush.bf16.msra.mxu2 %v3468_v14  ;;  %v3697_v9 = vld [vmem:[#allocation7 + $0xe8] sm:$0xf0]  ;;  %v3624_v10 = vor.u32 %v4200_v2, %v3623_v1  ;;  %v3628_v14 = vor.u32 %v4199_v39, %v3625_v3  ;;  %v3671_v39 = vld [vmem:[#allocation7 + $0xb0] sm:$0xf]  ;;  %v4212_v3 = vld [vmem:[#allocation7 + $0xb4] sm:$0xf0] }
 0x219   :  { %1862 = vmatpush.bf16.msra.mxu1 %v3544_v6  ;;  %1888 = vmatpush.bf16.msra.mxu3 %v3548_v8  ;;  %v4218_v6 = vld [vmem:[#allocation7 + $0xe4] sm:$0xf0]  ;;  %v4217_v8 = vld [vmem:[#allocation7 + $0xe4] sm:$0xf]  ;;  %v3601_v1 = vld [vmem:[#allocation7 + $0x28] sm:$0xf0] }
 0x21a   :  { %v3696_v7 = vor.u32 %v4218_v6, %v3695_v5  ;;  %v3700_v11 = vor.u32 %v4217_v8, %v3697_v9  ;;  %v4211_v5 = vld [vmem:[#allocation7 + $0xb4] sm:$0xf]  ;;  %v3672_v6 = vor.u32 %v4212_v3, %v3671_v39  ;;  %v3591_v9 = vld [vmem:[#allocation7 + $0x10] sm:$0xf]  ;;  %v3753_v3 = vld [vmem:[#allocation8 + $0x58] sm:$0xf0] }
 0x21b   :  { %1848 = vmatpush.bf16.msra.mxu0 %v3488_v26  ;;  %v3456_v26 = vor.u32 %v4158_v23, %v3455_v22  ;;  %v3688_v22 = vor.u32 %v4216_v16, %v3687_v15  ;;  %v3663_v15 = vld [vmem:[#allocation7 + $0xa0] sm:$0xf]  ;;  %v4210_v16 = vld [vmem:[#allocation7 + $0xa4] sm:$0xf0]  ;;  %v4231_v39 = vld [vmem:[#allocation8 + $0x54] sm:$0xf] }
 0x21d   :  { %1863 = vmatpush.bf16.msra.mxu1 %v3536_v18  ;;  %1889 = vmatpush.bf16.msra.mxu3 %v3540_v20  ;;  %v4197_v18 = vld [vmem:[#allocation7 + $0x44] sm:$0xf]  ;;  %v3689_v20 = vld [vmem:[#allocation7 + $0xd8] sm:$0xf0] }
 0x21e   :  { %v3692_v23 = vor.u32 %v4215_v17, %v3689_v20  ;;  %v4209_v17 = vld [vmem:[#allocation7 + $0xa4] sm:$0xf] }
 0x21f   :  { %1849 = vmatpush.bf16.msra.mxu0 %v3480_v34  ;;  %v3528_v34 = vor.u32 %v4176_v30, %v3527_v29 }
 0x221   :  { %1864 = vmatpush.bf16.msra.mxu1 %v3528_v34 }
 0x223   :  { %1850 = vmatpush.bf16.msra.mxu0 %v3472_v63  ;;  %v3708_v63 = vor.u32 %v4219_v60, %v3705_v37  ;;  %v3599_v60 = vld [vmem:[#allocation7 + $0x20] sm:$0xf]  ;;  %v4194_v37 = vld [vmem:[#allocation7 + $0x24] sm:$0xf0] }
 0x227   :  { %1851 = vmatpush.bf16.msra.mxu0 %v3464_v12  ;;  %v3615_v12 = vld [vmem:[#allocation7 + $0x40] sm:$0xf] }
 0x22b   :  { %1852 = vmatpush.bf16.msra.mxu0 %v3456_v26 }
 0x279   :  { %v1356_v25 = vpop.f32.mrf.mxu0 }
 0x27f   :  { %v1369_v40 = vpop.f32.mrf.mxu1  ;;  %v1382_v42 = vpop.f32.mrf.mxu2 }
 0x280   :  { %v1370_v43 = vadd.f32 %v1369_v40, %v1356_v25  ;;  %v4157_v25 = vld [vmem:[#allocation10 + $0x4] sm:$0xf]  ;;  %v3532_v40 = vor.u32 %v4175_v33, %v3529_v38 }
 0x281   :  { %v1358_v44 = vpop.f32.mrf.mxu0  ;;  %v3460_v28 = vor.u32 %v4157_v25, %v3457_v27  ;;  %v3616_v25 = vor.u32 %v4198_v13, %v3615_v12  ;;  %v3620_v27 = vor.u32 %v4197_v18, %v3617_v19  ;;  %v3593_v13 = vld [vmem:[#allocation7 + $0x18] sm:$0xf0]  ;;  %v3664_v18 = vor.u32 %v4210_v16, %v3663_v15  ;;  %v3665_v19 = vld [vmem:[#allocation7 + $0xa8] sm:$0xf0]  ;;  %v3815_v15 = vld [vmem:[#allocation8 + $0xd0] sm:$0xf] }
 0x282   :  { %v1399_v45 = vadd.f32 %v1370_v43, %v4590_v46  ;;  %1890 = vmatpush.bf16.msra.mxu3 %v3532_v40  ;;  %v4174_v43 = vld [vmem:[#allocation10 + $0x84] sm:$0xf0]  ;;  %v4173_v44 = vld [vmem:[#allocation10 + $0x84] sm:$0xf]  ;;  %v3668_v20 = vor.u32 %v4209_v17, %v3665_v19  ;;  %v4248_v16 = vld [vmem:[#allocation8 + $0xd4] sm:$0xf0] }
 0x283   :  { %1878 = vmatpush.bf16.msra.mxu2 %v3460_v28  ;;  %v4247_v17 = vld [vmem:[#allocation8 + $0xd4] sm:$0xf]  ;;  %v3745_v19 = vld [vmem:[#allocation8 + $0x48] sm:$0xf0] }
 0x284   :  { %v1401_v0 = vmax.f32 %v1399_v45, 0.0 }
 0x285   :  { %v1395_v48 = vpop.f32.mrf.mxu3 }
 0x286   :  { %v1403_v21 = vpack.c.bf16 %v1401_v0, %v1401_v0  ;;  %v1396_v49 = vadd.f32 %v1395_v48, %v1382_v42  ;;  %v3519_v42 = vld [vmem:[#allocation10 + $0x80] sm:$0xf]  ;;  %v3521_v0 = vld [vmem:[#allocation10 + $0x88] sm:$0xf0] }
 0x287   :  { %v1371_v50 = vpop.f32.mrf.mxu1  ;;  %v1384_v4 = vpop.f32.mrf.mxu2  ;;  %v3520_v45 = vor.u32 %v4174_v43, %v3519_v42  ;;  %v3524_v48 = vor.u32 %v4173_v44, %v3521_v0 }
 0x288   :  { %v1400_v51 = vadd.f32 %v1396_v49, %v4595_v54  ;;  %1605 = vmatmul.bf16.vlgmr.msrb.gmra.mxu0 %v1403_v21  ;;  %1631 = vmatmul.bf16.vlgmr.msrb.gmra.mxu2 %v1403_v21  ;;  %v3639_v21 = vld [vmem:[#allocation7 + $0x70] sm:$0xf]  ;;  %v4204_v49 = vld [vmem:[#allocation7 + $0x74] sm:$0xf0]  ;;  %v4203_v50 = vld [vmem:[#allocation7 + $0x74] sm:$0xf] }
 0x289   :  { %1865 = vmatpush.bf16.msra.mxu1 %v3520_v45  ;;  %1891 = vmatpush.bf16.msra.mxu3 %v3524_v48  ;;  %v3640_v4 = vor.u32 %v4204_v49, %v3639_v21 }
 0x28a   :  { %v1402_v52 = vmax.f32 %v1400_v51, 0.0  ;;  %v3641_v51 = vld [vmem:[#allocation7 + $0x78] sm:$0xf0] }
 0x28b   :  { %2102 = vmatpush.bf16.msrb.mxu0 %v3640_v4  ;;  %v4196_v4 = vld [vmem:[#allocation7 + $0x34] sm:$0xf0] }
 0x28c   :  { %v1404_v53 = vpack.c.bf16 %v1402_v52, %v1402_v52  ;;  %v3631_v52 = vld [vmem:[#allocation7 + $0x60] sm:$0xf] }
 0x28d   :  { %v1397_v55 = vpop.f32.mrf.mxu3 }
 0x28e   :  { %1618 = vmatmul.bf16.vlgmr.msrb.gmra.mxu1 %v1404_v53  ;;  %1644 = vmatmul.bf16.vlgmr.msrb.gmra.mxu3 %v1404_v53  ;;  %v4202_v53 = vld [vmem:[#allocation7 + $0x64] sm:$0xf0]  ;;  %v3644_v55 = vor.u32 %v4203_v50, %v3641_v51  ;;  %v3607_v50 = vld [vmem:[#allocation7 + $0x30] sm:$0xf]  ;;  %v4195_v51 = vld [vmem:[#allocation7 + $0x34] sm:$0xf] }
 0x28f   :  { %v3632_v58 = vor.u32 %v4202_v53, %v3631_v52  ;;  %2115 = vmatpush.bf16.msrb.mxu1 %v3704_v62  ;;  %2141 = vmatpush.bf16.msrb.mxu3 %v3708_v63  ;;  %v3608_v52 = vor.u32 %v4196_v4, %v3607_v50  ;;  %v3609_v53 = vld [vmem:[#allocation7 + $0x38] sm:$0xf0]  ;;  %v3600_v62 = vor.u32 %v4194_v37, %v3599_v60  ;;  %v4193_v63 = vld [vmem:[#allocation7 + $0x24] sm:$0xf]  ;;  %v4235_v50 = vld [vmem:[#allocation8 + $0x74] sm:$0xf] }
 0x290   :  { %2128 = vmatpush.bf16.msrb.mxu2 %v3644_v55  ;;  %v3612_v55 = vor.u32 %v4195_v51, %v3609_v53  ;;  %v3604_v2 = vor.u32 %v4193_v63, %v3601_v1  ;;  %v3769_v51 = vld [vmem:[#allocation8 + $0x78] sm:$0xf0]  ;;  %v4234_v53 = vld [vmem:[#allocation8 + $0x64] sm:$0xf0]  ;;  %v4251_v60 = vld [vmem:[#allocation8 + $0xf4] sm:$0xf] }
 0x291   :  { %2103 = vmatpush.bf16.msrb.mxu0 %v3632_v58  ;;  %v3680_v58 = vor.u32 %v4214_v24, %v3679_v56  ;;  %v4233_v56 = vld [vmem:[#allocation8 + $0x64] sm:$0xf]  ;;  %v3761_v24 = vld [vmem:[#allocation8 + $0x68] sm:$0xf0]  ;;  %v3833_v37 = vld [vmem:[#allocation8 + $0xf8] sm:$0xf0] }
 0x292   :  { %v3836_v63 = vor.u32 %v4251_v60, %v3833_v37  ;;  %v3751_v1 = vld [vmem:[#allocation8 + $0x50] sm:$0xf]  ;;  %v3727_v60 = vld [vmem:[#allocation8 + $0x20] sm:$0xf]  ;;  %v4226_v37 = vld [vmem:[#allocation8 + $0x24] sm:$0xf0] }
 0x293   :  { %2116 = vmatpush.bf16.msrb.mxu1 %v3696_v7  ;;  %2142 = vmatpush.bf16.msrb.mxu3 %v3700_v11  ;;  %v3673_v7 = vld [vmem:[#allocation7 + $0xb8] sm:$0xf0]  ;;  %v4191_v11 = vld [vmem:[#allocation7 + $0x14] sm:$0xf] }
 0x294   :  { %2129 = vmatpush.bf16.msrb.mxu2 %v3636_v61  ;;  %v3684_v61 = vor.u32 %v4213_v57, %v3681_v59  ;;  %v3676_v8 = vor.u32 %v4211_v5, %v3673_v7  ;;  %v3831_v57 = vld [vmem:[#allocation8 + $0xf0] sm:$0xf]  ;;  %v4252_v59 = vld [vmem:[#allocation8 + $0xf4] sm:$0xf0]  ;;  %v3823_v5 = vld [vmem:[#allocation8 + $0xe0] sm:$0xf] }
 0x295   :  { %2104 = vmatpush.bf16.msrb.mxu0 %v3624_v10  ;;  %v4192_v10 = vld [vmem:[#allocation7 + $0x14] sm:$0xf0] }
 0x296   :  { %v3592_v12 = vor.u32 %v4192_v10, %v3591_v9  ;;  %v3825_v9 = vld [vmem:[#allocation8 + $0xe8] sm:$0xf0] }
 0x297   :  { %2117 = vmatpush.bf16.msrb.mxu1 %v3688_v22  ;;  %2143 = vmatpush.bf16.msrb.mxu3 %v3692_v23  ;;  %v3583_v22 = vld [vmem:[#allocation7] sm:$0xf]  ;;  %v4190_v23 = vld [vmem:[#allocation7 + $0x4] sm:$0xf0] }
 0x298   :  { %2130 = vmatpush.bf16.msrb.mxu2 %v3628_v14  ;;  %v3596_v14 = vor.u32 %v4191_v11, %v3593_v13  ;;  %v4230_v13 = vld [vmem:[#allocation8 + $0x44] sm:$0xf0] }
 0x299   :  { %2105 = vmatpush.bf16.msrb.mxu0 %v3616_v25  ;;  %v4189_v25 = vld [vmem:[#allocation7 + $0x4] sm:$0xf] }
 0x29b   :  { %2118 = vmatpush.bf16.msrb.mxu1 %v3680_v58  ;;  %2144 = vmatpush.bf16.msrb.mxu3 %v3684_v61  ;;  %v3764_v61 = vor.u32 %v4233_v56, %v3761_v24  ;;  %v3807_v56 = vld [vmem:[#allocation8 + $0xc0] sm:$0xf]  ;;  %v4246_v24 = vld [vmem:[#allocation8 + $0xc4] sm:$0xf0] }
 0x29c   :  { %2131 = vmatpush.bf16.msrb.mxu2 %v3620_v27  ;;  %v3585_v27 = vld [vmem:[#allocation7 + $0x8] sm:$0xf0] }
 0x29d   :  { %2106 = vmatpush.bf16.msrb.mxu0 %v3608_v52  ;;  %v3759_v52 = vld [vmem:[#allocation8 + $0x60] sm:$0xf] }
 0x29e   :  { %v3760_v58 = vor.u32 %v4234_v53, %v3759_v52  ;;  %v3737_v53 = vld [vmem:[#allocation8 + $0x38] sm:$0xf0] }
 0x29f   :  { %2119 = vmatpush.bf16.msrb.mxu1 %v3672_v6  ;;  %2145 = vmatpush.bf16.msrb.mxu3 %v3676_v8  ;;  %v4250_v6 = vld [vmem:[#allocation8 + $0xe4] sm:$0xf0]  ;;  %v4249_v8 = vld [vmem:[#allocation8 + $0xe4] sm:$0xf] }
 0x2a0   :  { %2132 = vmatpush.bf16.msrb.mxu2 %v3612_v55  ;;  %v3772_v55 = vor.u32 %v4235_v50, %v3769_v51  ;;  %v3824_v7 = vor.u32 %v4250_v6, %v3823_v5  ;;  %v3828_v11 = vor.u32 %v4249_v8, %v3825_v9  ;;  %v4228_v51 = vld [vmem:[#allocation8 + $0x34] sm:$0xf0]  ;;  %v4243_v5 = vld [vmem:[#allocation8 + $0xb4] sm:$0xf]  ;;  %v3719_v9 = vld [vmem:[#allocation8 + $0x10] sm:$0xf] }
 0x2a1   :  { %2107 = vmatpush.bf16.msrb.mxu0 %v3600_v62  ;;  %v3832_v62 = vor.u32 %v4252_v59, %v3831_v57  ;;  %v4245_v57 = vld [vmem:[#allocation8 + $0xc4] sm:$0xf]  ;;  %v3809_v59 = vld [vmem:[#allocation8 + $0xc8] sm:$0xf0] }
 0x2a3   :  { %2120 = vmatpush.bf16.msrb.mxu1 %v3664_v18  ;;  %2146 = vmatpush.bf16.msrb.mxu3 %v3668_v20  ;;  %v4229_v18 = vld [vmem:[#allocation8 + $0x44] sm:$0xf]  ;;  %v3817_v20 = vld [vmem:[#allocation8 + $0xd8] sm:$0xf0] }
 0x2a4   :  { %2133 = vmatpush.bf16.msrb.mxu2 %v3604_v2  ;;  %v4232_v2 = vld [vmem:[#allocation8 + $0x54] sm:$0xf0] }
 0x2a5   :  { %2108 = vmatpush.bf16.msrb.mxu0 %v3592_v12  ;;  %v3752_v10 = vor.u32 %v4232_v2, %v3751_v1  ;;  %v3743_v12 = vld [vmem:[#allocation8 + $0x40] sm:$0xf]  ;;  %v3729_v1 = vld [vmem:[#allocation8 + $0x28] sm:$0xf0] }
 0x2a8   :  { %2134 = vmatpush.bf16.msrb.mxu2 %v3596_v14  ;;  %v3756_v14 = vor.u32 %v4231_v39, %v3753_v3  ;;  %v3799_v39 = vld [vmem:[#allocation8 + $0xb0] sm:$0xf]  ;;  %v4244_v3 = vld [vmem:[#allocation8 + $0xb4] sm:$0xf0] }
 0x2a9   :  { %v3800_v6 = vor.u32 %v4244_v3, %v3799_v39  ;;  %v4263_v39 = vld [vmem:[#allocation10 + $0x54] sm:$0xf]  ;;  %v3881_v3 = vld [vmem:[#allocation10 + $0x58] sm:$0xf0] }
 0x305   :  { %v1606_v26 = vpop.f32.mrf.mxu0 }
 0x306   :  { %v1607_v28 = vadd.f32 %v1606_v26, %v4601_v31  ;;  %v3584_v26 = vor.u32 %v4190_v23, %v3583_v22  ;;  %v3816_v22 = vor.u32 %v4248_v16, %v3815_v15  ;;  %v3820_v23 = vor.u32 %v4247_v17, %v3817_v20  ;;  %v3791_v15 = vld [vmem:[#allocation8 + $0xa0] sm:$0xf]  ;;  %v4242_v16 = vld [vmem:[#allocation8 + $0xa4] sm:$0xf0]  ;;  %v4241_v17 = vld [vmem:[#allocation8 + $0xa4] sm:$0xf] }
 0x308   :  { %2109 = vmatpush.bf16.msrb.mxu0 %v3584_v26  ;;  %v3744_v26 = vor.u32 %v4230_v13, %v3743_v12  ;;  %v3721_v13 = vld [vmem:[#allocation8 + $0x18] sm:$0xf0] }
 0x30b   :  { %v1619_v29 = vpop.f32.mrf.mxu1  ;;  %v1632_v30 = vpop.f32.mrf.mxu2 }
 0x30c   :  { %v1620_v33 = vadd.f32 %v1619_v29, %v1607_v28  ;;  %v1633_v42 = vadd.f32 %v1632_v30, %v4604_v36  ;;  %v3588_v28 = vor.u32 %v4189_v25, %v3585_v27  ;;  %v3655_v29 = vld [vmem:[#allocation7 + $0x90] sm:$0xf]  ;;  %v4208_v30 = vld [vmem:[#allocation7 + $0x94] sm:$0xf0]  ;;  %v3748_v27 = vor.u32 %v4229_v18, %v3745_v19  ;;  %v3793_v19 = vld [vmem:[#allocation8 + $0xa8] sm:$0xf0] }
 0x30d   :  { %v1608_v34 = vpop.f32.mrf.mxu0  ;;  %v3792_v18 = vor.u32 %v4242_v16, %v3791_v15  ;;  %v3796_v20 = vor.u32 %v4241_v17, %v3793_v19  ;;  %v3943_v15 = vld [vmem:[#allocation10 + $0xd0] sm:$0xf]  ;;  %v4280_v16 = vld [vmem:[#allocation10 + $0xd4] sm:$0xf0]  ;;  %v4279_v17 = vld [vmem:[#allocation10 + $0xd4] sm:$0xf] }
 0x30e   :  { %v1649_v38 = vmax.f32 %v1620_v33, 0.0  ;;  %v4207_v33 = vld [vmem:[#allocation7 + $0x94] sm:$0xf]  ;;  %v3656_v34 = vor.u32 %v4208_v30, %v3655_v29  ;;  %2135 = vmatpush.bf16.msrb.mxu2 %v3588_v28  ;;  %v3873_v19 = vld [vmem:[#allocation10 + $0x48] sm:$0xf0] }
 0x310   :  { %v1651_v40 = vpack.c.bf16 %v1649_v38, %v1649_v38  ;;  %v3657_v38 = vld [vmem:[#allocation7 + $0x98] sm:$0xf0]  ;;  %2121 = vmatpush.bf16.msrb.mxu1 %v3656_v34 }
 0x311   :  { %v1645_v43 = vpop.f32.mrf.mxu3 }
 0x312   :  { %v1646_v44 = vadd.f32 %v1645_v43, %v1633_v42  ;;  %1853 = vmatmul.bf16.vlgmr.msra.gmra.mxu0 %v1651_v40  ;;  %1879 = vmatmul.bf16.vlgmr.msra.gmra.mxu2 %v1651_v40  ;;  %v3660_v40 = vor.u32 %v4207_v33, %v3657_v38  ;;  %v3647_v42 = vld [vmem:[#allocation7 + $0x80] sm:$0xf]  ;;  %v4206_v43 = vld [vmem:[#allocation7 + $0x84] sm:$0xf0] }
 0x313   :  { %v1621_v45 = vpop.f32.mrf.mxu1  ;;  %v1634_v0 = vpop.f32.mrf.mxu2  ;;  %2378 = vmatpush.bf16.msra.mxu2 %v3772_v55 }
 0x314   :  { %v1650_v48 = vmax.f32 %v1646_v44, 0.0  ;;  %2147 = vmatpush.bf16.msrb.mxu3 %v3660_v40  ;;  %v4205_v44 = vld [vmem:[#allocation7 + $0x84] sm:$0xf]  ;;  %v3648_v45 = vor.u32 %v4206_v43, %v3647_v42  ;;  %v3649_v0 = vld [vmem:[#allocation7 + $0x88] sm:$0xf0] }
 0x316   :  { %v1652_v21 = vpack.c.bf16 %v1650_v48, %v1650_v48  ;;  %v3652_v48 = vor.u32 %v4205_v44, %v3649_v0  ;;  %2122 = vmatpush.bf16.msrb.mxu1 %v3648_v45 }
 0x317   :  { %2379 = vmatpush.bf16.msra.mxu2 %v3764_v61  ;;  %v3812_v61 = vor.u32 %v4245_v57, %v3809_v59  ;;  %v3959_v57 = vld [vmem:[#allocation10 + $0xf0] sm:$0xf]  ;;  %v4284_v59 = vld [vmem:[#allocation10 + $0xf4] sm:$0xf0] }
 0x318   :  { %1866 = vmatmul.bf16.vlgmr.msra.gmra.mxu1 %v1652_v21  ;;  %1892 = vmatmul.bf16.vlgmr.msra.gmra.mxu3 %v1652_v21  ;;  %v3767_v21 = vld [vmem:[#allocation8 + $0x70] sm:$0xf] }
 0x319   :  { %v1647_v49 = vpop.f32.mrf.mxu3  ;;  %2148 = vmatpush.bf16.msrb.mxu3 %v3652_v48 }
 0x31a   :  { %v4236_v49 = vld [vmem:[#allocation8 + $0x74] sm:$0xf0]  ;;  %2365 = vmatpush.bf16.msra.mxu1 %v3832_v62  ;;  %v3728_v62 = vor.u32 %v4226_v37, %v3727_v60  ;;  %v4283_v60 = vld [vmem:[#allocation10 + $0xf4] sm:$0xf]  ;;  %v3961_v37 = vld [vmem:[#allocation10 + $0xf8] sm:$0xf0] }
 0x31b   :  { %v3768_v4 = vor.u32 %v4236_v49, %v3767_v21  ;;  %2380 = vmatpush.bf16.msra.mxu2 %v3756_v14 }
 0x31d   :  { %2352 = vmatpush.bf16.msra.mxu0 %v3768_v4  ;;  %2391 = vmatpush.bf16.msra.mxu3 %v3836_v63  ;;  %v3735_v4 = vld [vmem:[#allocation8 + $0x30] sm:$0xf]  ;;  %v4225_v63 = vld [vmem:[#allocation8 + $0x24] sm:$0xf] }
 0x31e   :  { %2366 = vmatpush.bf16.msra.mxu1 %v3824_v7  ;;  %v3736_v52 = vor.u32 %v4228_v51, %v3735_v4  ;;  %v3732_v2 = vor.u32 %v4225_v63, %v3729_v1  ;;  %v3801_v7 = vld [vmem:[#allocation8 + $0xb8] sm:$0xf0]  ;;  %v4267_v4 = vld [vmem:[#allocation10 + $0x74] sm:$0xf]  ;;  %v3964_v63 = vor.u32 %v4283_v60, %v3961_v37  ;;  %v3879_v1 = vld [vmem:[#allocation10 + $0x50] sm:$0xf] }
 0x31f   :  { %2381 = vmatpush.bf16.msra.mxu2 %v3748_v27  ;;  %v3804_v8 = vor.u32 %v4243_v5, %v3801_v7  ;;  %v3713_v27 = vld [vmem:[#allocation8 + $0x8] sm:$0xf0]  ;;  %v3951_v5 = vld [vmem:[#allocation10 + $0xe0] sm:$0xf]  ;;  %v4258_v37 = vld [vmem:[#allocation10 + $0x24] sm:$0xf0] }
 0x320   :  { %v3855_v60 = vld [vmem:[#allocation10 + $0x20] sm:$0xf] }
 0x321   :  { %2353 = vmatpush.bf16.msra.mxu0 %v3760_v58  ;;  %2392 = vmatpush.bf16.msra.mxu3 %v3828_v11  ;;  %v3808_v58 = vor.u32 %v4246_v24, %v3807_v56  ;;  %v4223_v11 = vld [vmem:[#allocation8 + $0x14] sm:$0xf]  ;;  %v4265_v56 = vld [vmem:[#allocation10 + $0x64] sm:$0xf]  ;;  %v3889_v24 = vld [vmem:[#allocation10 + $0x68] sm:$0xf0] }
 0x322   :  { %2367 = vmatpush.bf16.msra.mxu1 %v3816_v22  ;;  %v3724_v14 = vor.u32 %v4223_v11, %v3721_v13  ;;  %v3711_v22 = vld [vmem:[#allocation8] sm:$0xf]  ;;  %v4262_v13 = vld [vmem:[#allocation10 + $0x44] sm:$0xf0] }
 0x325   :  { %2354 = vmatpush.bf16.msra.mxu0 %v3752_v10  ;;  %2393 = vmatpush.bf16.msra.mxu3 %v3820_v23  ;;  %v4224_v10 = vld [vmem:[#allocation8 + $0x14] sm:$0xf0]  ;;  %v4222_v23 = vld [vmem:[#allocation8 + $0x4] sm:$0xf0] }
 0x326   :  { %2368 = vmatpush.bf16.msra.mxu1 %v3808_v58  ;;  %v3720_v12 = vor.u32 %v4224_v10, %v3719_v9  ;;  %v3953_v9 = vld [vmem:[#allocation10 + $0xe8] sm:$0xf0] }
 0x329   :  { %2355 = vmatpush.bf16.msra.mxu0 %v3744_v26  ;;  %2394 = vmatpush.bf16.msra.mxu3 %v3812_v61  ;;  %v3712_v26 = vor.u32 %v4222_v23, %v3711_v22  ;;  %v3892_v61 = vor.u32 %v4265_v56, %v3889_v24  ;;  %v3944_v22 = vor.u32 %v4280_v16, %v3943_v15  ;;  %v3935_v56 = vld [vmem:[#allocation10 + $0xc0] sm:$0xf]  ;;  %v4278_v24 = vld [vmem:[#allocation10 + $0xc4] sm:$0xf0]  ;;  %v4273_v15 = vld [vmem:[#allocation10 + $0xa4] sm:$0xf] }
 0x32a   :  { %2369 = vmatpush.bf16.msra.mxu1 %v3800_v6  ;;  %v4282_v6 = vld [vmem:[#allocation10 + $0xe4] sm:$0xf0] }
 0x32b   :  { %v3952_v7 = vor.u32 %v4282_v6, %v3951_v5  ;;  %v3929_v5 = vld [vmem:[#allocation10 + $0xb8] sm:$0xf0] }
 0x32d   :  { %2356 = vmatpush.bf16.msra.mxu0 %v3736_v52  ;;  %2395 = vmatpush.bf16.msra.mxu3 %v3804_v8  ;;  %v3887_v52 = vld [vmem:[#allocation10 + $0x60] sm:$0xf]  ;;  %v4281_v8 = vld [vmem:[#allocation10 + $0xe4] sm:$0xf] }
 0x32e   :  { %2370 = vmatpush.bf16.msra.mxu1 %v3792_v18  ;;  %v3956_v11 = vor.u32 %v4281_v8, %v3953_v9  ;;  %v4261_v18 = vld [vmem:[#allocation10 + $0x44] sm:$0xf]  ;;  %v4256_v8 = vld [vmem:[#allocation10 + $0x14] sm:$0xf0]  ;;  %v4255_v9 = vld [vmem:[#allocation10 + $0x14] sm:$0xf] }
 0x331   :  { %2357 = vmatpush.bf16.msra.mxu0 %v3728_v62  ;;  %2396 = vmatpush.bf16.msra.mxu3 %v3796_v20  ;;  %v3960_v62 = vor.u32 %v4284_v59, %v3959_v57  ;;  %v3945_v20 = vld [vmem:[#allocation10 + $0xd8] sm:$0xf0]  ;;  %v4277_v57 = vld [vmem:[#allocation10 + $0xc4] sm:$0xf] }
 0x332   :  { %v3948_v23 = vor.u32 %v4279_v17, %v3945_v20  ;;  %v3921_v17 = vld [vmem:[#allocation10 + $0xa8] sm:$0xf0]  ;;  %v4254_v20 = vld [vmem:[#allocation10 + $0x4] sm:$0xf0] }
 0x335   :  { %2358 = vmatpush.bf16.msra.mxu0 %v3720_v12  ;;  %v3871_v12 = vld [vmem:[#allocation10 + $0x40] sm:$0xf] }
 0x339   :  { %2359 = vmatpush.bf16.msra.mxu0 %v3712_v26  ;;  %v3872_v26 = vor.u32 %v4262_v13, %v3871_v12  ;;  %v3919_v13 = vld [vmem:[#allocation10 + $0xa0] sm:$0xf] }
 0x38f   :  { %v1854_v25 = vpop.f32.mrf.mxu0 }
 0x395   :  { %v1867_v28 = vpop.f32.mrf.mxu1  ;;  %v1880_v29 = vpop.f32.mrf.mxu2 }
 0x396   :  { %v1868_v30 = vadd.f32 %v1867_v28, %v1854_v25  ;;  %v4221_v25 = vld [vmem:[#allocation8 + $0x4] sm:$0xf] }
 0x397   :  { %v1856_v33 = vpop.f32.mrf.mxu0  ;;  %v3716_v28 = vor.u32 %v4221_v25, %v3713_v27  ;;  %v3876_v27 = vor.u32 %v4261_v18, %v3873_v19  ;;  %v3924_v18 = vor.u32 %v4273_v15, %v3921_v17  ;;  %v3839_v19 = vld [vmem:[#allocation10] sm:$0xf] }
 0x398   :  { %v1897_v34 = vadd.f32 %v1868_v30, %v4614_v35  ;;  %v4240_v30 = vld [vmem:[#allocation8 + $0x94] sm:$0xf0]  ;;  %v4239_v33 = vld [vmem:[#allocation8 + $0x94] sm:$0xf] }
 0x39a   :  { %v4635_v38 = vadd.f32 %v1897_v34, %v4610_v32 }
 0x39b   :  { %v1893_v40 = vpop.f32.mrf.mxu3 }
 0x39c   :  { %v1894_v42 = vadd.f32 %v1893_v40, %v1880_v29  ;;  %v1908_v43 = vpack.c.bf16 %v4635_v38, %v4635_v38  ;;  %v3783_v29 = vld [vmem:[#allocation8 + $0x90] sm:$0xf]  ;;  %v3785_v40 = vld [vmem:[#allocation8 + $0x98] sm:$0xf0] }
 0x39d   :  { %v1869_v44 = vpop.f32.mrf.mxu1  ;;  %v1882_v45 = vpop.f32.mrf.mxu2  ;;  %v3784_v34 = vor.u32 %v4240_v30, %v3783_v29  ;;  %v4260_v29 = vld [vmem:[#allocation10 + $0x34] sm:$0xf0]  ;;  %v4259_v30 = vld [vmem:[#allocation10 + $0x34] sm:$0xf] }
 0x39e   :  { %v1898_v0 = vadd.f32 %v1894_v42, %v4622_v47  ;;  %2110 = vmatmul.bf16.vlgmr.msrb.gmra.mxu0 %v1908_v43  ;;  %2136 = vmatmul.bf16.vlgmr.msrb.gmra.mxu2 %v1908_v43  ;;  %v4227_v47 = vld [vmem:[#allocation8 + $0x34] sm:$0xf]  ;;  %v3788_v42 = vor.u32 %v4239_v33, %v3785_v40  ;;  %v3775_v43 = vld [vmem:[#allocation8 + $0x80] sm:$0xf]  ;;  %v4238_v44 = vld [vmem:[#allocation8 + $0x84] sm:$0xf0] }
 0x39f   :  { %v3740_v55 = vor.u32 %v4227_v47, %v3737_v53  ;;  %2371 = vmatpush.bf16.msra.mxu1 %v3784_v34  ;;  %v4237_v45 = vld [vmem:[#allocation8 + $0x84] sm:$0xf]  ;;  %v3897_v47 = vld [vmem:[#allocation10 + $0x78] sm:$0xf0]  ;;  %v4266_v53 = vld [vmem:[#allocation10 + $0x64] sm:$0xf0] }
 0x3a0   :  { %v4641_v48 = vadd.f32 %v1898_v0, %v4616_v41  ;;  %2397 = vmatpush.bf16.msra.mxu3 %v3788_v42  ;;  %v3776_v0 = vor.u32 %v4238_v44, %v3775_v43  ;;  %v3888_v58 = vor.u32 %v4266_v53, %v3887_v52  ;;  %v3865_v33 = vld [vmem:[#allocation10 + $0x38] sm:$0xf0] }
 0x3a1   :  { %2382 = vmatpush.bf16.msra.mxu2 %v3740_v55  ;;  %v3900_v55 = vor.u32 %v4267_v4, %v3897_v47  ;;  %v3868_v40 = vor.u32 %v4259_v30, %v3865_v33  ;;  %v3913_v33 = vld [vmem:[#allocation10 + $0x98] sm:$0xf0] }
 0x3a2   :  { %v1903_v21 = vrot.slane %v4641_v48, 6  ;;  %v1909_v35 = vpack.c.bf16 %v4641_v48, %v4641_v48 }
 0x3a3   :  { %v1895_v49 = vpop.f32.mrf.mxu3  ;;  %2372 = vmatpush.bf16.msra.mxu1 %v3776_v0 }
 0x3a4   :  { %2123 = vmatmul.bf16.vlgmr.msrb.gmra.mxu1 %v1909_v35  ;;  %2149 = vmatmul.bf16.vlgmr.msrb.gmra.mxu3 %v1909_v35  ;;  %v1904_v50 = vsel %vm1149_vm0, %v4635_v38, %v1903_v21  ;;  %v3777_v21 = vld [vmem:[#allocation8 + $0x88] sm:$0xf0]  ;;  %v3895_v49 = vld [vmem:[#allocation10 + $0x70] sm:$0xf] }
 0x3a5   :  { %1907 = vst [vmem:[#allocation13 + $0x4] sm:$0xf] %v1904_v50  ;;  %2383 = vmatpush.bf16.msra.mxu2 %v3732_v2  ;;  %v3780_v35 = vor.u32 %v4237_v45, %v3777_v21  ;;  %v4268_v50 = vld [vmem:[#allocation10 + $0x74] sm:$0xf0] }
 0x3a6   :  { %v3896_v51 = vor.u32 %v4268_v50, %v3895_v49  ;;  %v4264_v2 = vld [vmem:[#allocation10 + $0x54] sm:$0xf0] }
 0x3a7   :  { %2398 = vmatpush.bf16.msra.mxu3 %v3780_v35  ;;  %2613 = vmatpush.bf16.msrb.mxu1 %v3960_v62  ;;  %v3880_v10 = vor.u32 %v4264_v2, %v3879_v1  ;;  %v3856_v62 = vor.u32 %v4258_v37, %v3855_v60  ;;  %v3927_v1 = vld [vmem:[#allocation10 + $0xb0] sm:$0xf]  ;;  %v4276_v2 = vld [vmem:[#allocation10 + $0xb4] sm:$0xf0] }
 0x3a8   :  { %2600 = vmatpush.bf16.msrb.mxu0 %v3896_v51 }
 0x3a9   :  { %2384 = vmatpush.bf16.msra.mxu2 %v3724_v14  ;;  %v3884_v14 = vor.u32 %v4263_v39, %v3881_v3  ;;  %v4275_v39 = vld [vmem:[#allocation10 + $0xb4] sm:$0xf]  ;;  %v3928_v3 = vor.u32 %v4276_v2, %v3927_v1 }
 0x3aa   :  { %v3932_v6 = vor.u32 %v4275_v39, %v3929_v5 }
 0x3ab   :  { %2639 = vmatpush.bf16.msrb.mxu3 %v3964_v63  ;;  %2614 = vmatpush.bf16.msrb.mxu1 %v3952_v7  ;;  %v3857_v63 = vld [vmem:[#allocation10 + $0x28] sm:$0xf0]  ;;  %v3847_v7 = vld [vmem:[#allocation10 + $0x10] sm:$0xf] }
 0x3ac   :  { %2601 = vmatpush.bf16.msrb.mxu0 %v3888_v58  ;;  %v3937_v58 = vld [vmem:[#allocation10 + $0xc8] sm:$0xf0] }
 0x3ad   :  { %2385 = vmatpush.bf16.msra.mxu2 %v3716_v28  ;;  %v3863_v28 = vld [vmem:[#allocation10 + $0x30] sm:$0xf]  ;;  %v3940_v59 = vor.u32 %v4277_v57, %v3937_v58 }
 0x3ae   :  { %v3864_v34 = vor.u32 %v4260_v29, %v3863_v28  ;;  %v4272_v28 = vld [vmem:[#allocation10 + $0x94] sm:$0xf0]  ;;  %v4271_v29 = vld [vmem:[#allocation10 + $0x94] sm:$0xf] }
 0x3af   :  { %2640 = vmatpush.bf16.msrb.mxu3 %v3956_v11  ;;  %2615 = vmatpush.bf16.msrb.mxu1 %v3944_v22  ;;  %v3849_v11 = vld [vmem:[#allocation10 + $0x18] sm:$0xf0]  ;;  %v4253_v22 = vld [vmem:[#allocation10 + $0x4] sm:$0xf] }
 0x3b0   :  { %2602 = vmatpush.bf16.msrb.mxu0 %v3880_v10  ;;  %v3848_v10 = vor.u32 %v4256_v8, %v3847_v7  ;;  %v3852_v12 = vor.u32 %v4255_v9, %v3849_v11 }
 0x3b1   :  { %2626 = vmatpush.bf16.msrb.mxu2 %v3900_v55 }
 0x3b3   :  { %2641 = vmatpush.bf16.msrb.mxu3 %v3948_v23  ;;  %v3840_v23 = vor.u32 %v4254_v20, %v3839_v19 }
 0x3b4   :  { %2603 = vmatpush.bf16.msrb.mxu0 %v3872_v26 }
 0x3b5   :  { %2627 = vmatpush.bf16.msrb.mxu2 %v3892_v61  ;;  %v4257_v61 = vld [vmem:[#allocation10 + $0x24] sm:$0xf] }
 0x3b7   :  { %2642 = vmatpush.bf16.msrb.mxu3 %v3940_v59 }
 0x3b8   :  { %2604 = vmatpush.bf16.msrb.mxu0 %v3864_v34  ;;  %v3916_v34 = vor.u32 %v4271_v29, %v3913_v33 }
 0x3b9   :  { %2628 = vmatpush.bf16.msrb.mxu2 %v3884_v14  ;;  %v4274_v14 = vld [vmem:[#allocation10 + $0xa4] sm:$0xf0] }
 0x3ba   :  { %v3920_v16 = vor.u32 %v4274_v14, %v3919_v13 }
 0x3bb   :  { %2643 = vmatpush.bf16.msrb.mxu3 %v3932_v6 }
 0x3bc   :  { %2605 = vmatpush.bf16.msrb.mxu0 %v3856_v62 }
 0x3bd   :  { %2629 = vmatpush.bf16.msrb.mxu2 %v3876_v27  ;;  %v3911_v27 = vld [vmem:[#allocation10 + $0x90] sm:$0xf] }
 0x3be   :  { %v3912_v30 = vor.u32 %v4272_v28, %v3911_v27 }
 0x3bf   :  { %2644 = vmatpush.bf16.msrb.mxu3 %v3924_v18 }
 0x3c0   :  { %2606 = vmatpush.bf16.msrb.mxu0 %v3848_v10 }
 0x3c1   :  { %2630 = vmatpush.bf16.msrb.mxu2 %v3868_v40  ;;  %v3903_v40 = vld [vmem:[#allocation10 + $0x80] sm:$0xf] }
 0x3c3   :  { %2645 = vmatpush.bf16.msrb.mxu3 %v3916_v34 }
 0x3c4   :  { %2607 = vmatpush.bf16.msrb.mxu0 %v3840_v23 }
 0x41b   :  { %v2111_v25 = vpop.f32.mrf.mxu0 }
 0x421   :  { %v2124_v42 = vpop.f32.mrf.mxu1  ;;  %v2137_v43 = vpop.f32.mrf.mxu2 }
 0x422   :  { %v2125_v44 = vadd.f32 %v2124_v42, %v2111_v25  ;;  %v3841_v25 = vld [vmem:[#allocation10 + $0x8] sm:$0xf0]  ;;  %v4270_v42 = vld [vmem:[#allocation10 + $0x84] sm:$0xf0] }
 0x423   :  { %v2113_v45 = vpop.f32.mrf.mxu0  ;;  %v3844_v26 = vor.u32 %v4253_v22, %v3841_v25 }
 0x424   :  { %v2154_v0 = vadd.f32 %v2125_v44, %v4590_v46  ;;  %v3936_v46 = vor.u32 %v4278_v24, %v3935_v56  ;;  %v3904_v44 = vor.u32 %v4270_v42, %v3903_v40  ;;  %v3905_v45 = vld [vmem:[#allocation10 + $0x88] sm:$0xf0] }
 0x426   :  { %v2156_v21 = vmax.f32 %v2154_v0, 0.0  ;;  %2616 = vmatpush.bf16.msrb.mxu1 %v3936_v46 }
 0x427   :  { %v2150_v35 = vpop.f32.mrf.mxu3 }
 0x428   :  { %v2158_v49 = vpack.c.bf16 %v2156_v21, %v2156_v21  ;;  %v2151_v50 = vadd.f32 %v2150_v35, %v2137_v43  ;;  %v4269_v43 = vld [vmem:[#allocation10 + $0x84] sm:$0xf] }
 0x429   :  { %v2126_v4 = vpop.f32.mrf.mxu1  ;;  %v2139_v51 = vpop.f32.mrf.mxu2  ;;  %v3908_v0 = vor.u32 %v4269_v43, %v3905_v45 }
 0x42a   :  { %v2155_v47 = vadd.f32 %v2151_v50, %v4595_v54  ;;  %2360 = vmatmul.bf16.vlgmr.msra.gmra.mxu0 %v2158_v49  ;;  %2386 = vmatmul.bf16.vlgmr.msra.gmra.mxu2 %v2158_v49  ;;  %v3860_v54 = vor.u32 %v4257_v61, %v3857_v63 }
 0x42b   :  { %2617 = vmatpush.bf16.msrb.mxu1 %v3928_v3  ;;  %2646 = vmatpush.bf16.msrb.mxu3 %v3908_v0 }
 0x42c   :  { %v2157_v52 = vmax.f32 %v2155_v47, 0.0  ;;  %2631 = vmatpush.bf16.msrb.mxu2 %v3860_v54 }
 0x42e   :  { %v2159_v53 = vpack.c.bf16 %v2157_v52, %v2157_v52 }
 0x42f   :  { %v2152_v55 = vpop.f32.mrf.mxu3  ;;  %2618 = vmatpush.bf16.msrb.mxu1 %v3920_v16 }
 0x430   :  { %2373 = vmatmul.bf16.vlgmr.msra.gmra.mxu1 %v2159_v53  ;;  %2399 = vmatmul.bf16.vlgmr.msra.gmra.mxu3 %v2159_v53 }
 0x431   :  { %2632 = vmatpush.bf16.msrb.mxu2 %v3852_v12 }
 0x433   :  { %2619 = vmatpush.bf16.msrb.mxu1 %v3912_v30 }
 0x435   :  { %2633 = vmatpush.bf16.msrb.mxu2 %v3844_v26 }
 0x437   :  { %2620 = vmatpush.bf16.msrb.mxu1 %v3904_v44 }
 0x4a7   :  { %v2361_v21 = vpop.f32.mrf.mxu0 }
 0x4a8   :  { %v2362_v35 = vadd.f32 %v2361_v21, %v4601_v31 }
 0x4ad   :  { %v2374_v49 = vpop.f32.mrf.mxu1  ;;  %v2387_v50 = vpop.f32.mrf.mxu2 }
 0x4ae   :  { %v2375_v4 = vadd.f32 %v2374_v49, %v2362_v35  ;;  %v2388_v53 = vadd.f32 %v2387_v50, %v4604_v36 }
 0x4af   :  { %v2363_v51 = vpop.f32.mrf.mxu0 }
 0x4b0   :  { %v2404_v47 = vmax.f32 %v2375_v4, 0.0 }
 0x4b2   :  { %v2406_v52 = vpack.c.bf16 %v2404_v47, %v2404_v47 }
 0x4b3   :  { %v2400_v55 = vpop.f32.mrf.mxu3 }
 0x4b4   :  { %v2401_v56 = vadd.f32 %v2400_v55, %v2388_v53  ;;  %2608 = vmatmul.bf16.vlgmr.msrb.gmra.mxu0 %v2406_v52  ;;  %2634 = vmatmul.bf16.vlgmr.msrb.gmra.mxu2 %v2406_v52 }
 0x4b5   :  { %v2376_v24 = vpop.f32.mrf.mxu1  ;;  %v2389_v57 = vpop.f32.mrf.mxu2 }
 0x4b6   :  { %v2405_v46 = vmax.f32 %v2401_v56, 0.0 }
 0x4b8   :  { %v2407_v58 = vpack.c.bf16 %v2405_v46, %v2405_v46 }
 0x4ba   :  { %2621 = vmatmul.bf16.vlgmr.msrb.gmra.mxu1 %v2407_v58  ;;  %2647 = vmatmul.bf16.vlgmr.msrb.gmra.mxu3 %v2407_v58 }
 0x4bb   :  { %v2402_v59 = vpop.f32.mrf.mxu3 }
 0x531   :  { %v2609_v31 = vpop.f32.mrf.mxu0 }
 0x537   :  { %v2622_v60 = vpop.f32.mrf.mxu1  ;;  %v2635_v37 = vpop.f32.mrf.mxu2 }
 0x538   :  { %v2623_v62 = vadd.f32 %v2622_v60, %v2609_v31 }
 0x539   :  { %v2611_v61 = vpop.f32.mrf.mxu0 }
 0x53a   :  { %v2652_v2 = vadd.f32 %v2623_v62, %v4635_v38 }
 0x53c   :  { %v2654_v5 = vadd.f32 %v2652_v2, %v4610_v32 }
 0x53d   :  { %v2648_v63 = vpop.f32.mrf.mxu3 }
 0x53e   :  { %v2649_v54 = vadd.f32 %v2648_v63, %v2635_v37 }
 0x53f   :  { %v2624_v1 = vpop.f32.mrf.mxu1  ;;  %v2637_v36 = vpop.f32.mrf.mxu2 }
 0x540   :  { %v2653_v39 = vadd.f32 %v2649_v54, %v4641_v48 }
 0x542   :  { %v2655_v3 = vadd.f32 %v2653_v39, %v4616_v41 }
 0x544   :  { %v2658_v6 = vrot.slane %v2655_v3, 6 }
 0x545   :  { %v2650_v7 = vpop.f32.mrf.mxu3 }
 0x546   :  { %v2659_v8 = vsel %vm1149_vm0, %v2654_v5, %v2658_v6 }
 0x547   :  { %2662 = vst [vmem:[#allocation13 + $0x8] sm:$0xf] %v2659_v8 }
 0x548   :  { %2675 = dma.vmem_to_hbm [thread:$0]  %s2668_s18, 192, %s2670_s21, [#allocation4], %s4483_s1, %s4483_s1, %s4484_s22  }
 0x549   :  { %4472 = dma.done.wait [#allocation4], 192  }
 0x54a   :  { %4473 = vsyncadd [#allocation4], 4294967104 }
 0x54b   :  { %2680 = vsyncpa [#allocation3], 1 }
 0x54c   :  { %2681 = vsyncpa [#allocation6], 1 }
 0x54d   :  { %2682 = vsyncpa [#allocation9], 1 }
 0x54e   :  { %2683 = vsyncpa [#allocation12], 1 }
 0x54f   :  { %2684 = vsyncpa [#allocation4], 1 }

</bundles_post_ra>
